<compile_context>
chip_gen: v6e
topology: v6e:2x2x1
jax: 0.10.0
libtpu: 0.0.40
codegen_flags: <defaults>
</compile_context>

<pallas_src>
import numpy as np
import jax
import jax.numpy as jnp
from jax import lax
from jax.experimental import pallas as pl
from jax.experimental.pallas import tpu as pltpu

# ----------------------------- hyper-variables ------------------------------
B = 2            # batch
L = 16           # L_span (time length)
D = 32           # hidden_dim
H = 32           # INFF_siren_hidden (== hidden_dim; SIREN packing relies on H == D == 2L)
S_IN = 4         # LFT_siren_dim_in
OMEGA = 30.0     # INFF_siren_omega
F_BASE = L // 2 + 1    # rfft bins (f_base) = 9
FREQ_SPAN = 8          # freq_span < f_base -> exercises truncation branch
EPS = 1e-5

F = FREQ_SPAN
_S_PAD = 8             # S_IN padded to one sublane group (lane 4 = ones column -> bias fold)
LANES = 2 * B * D      # 128 : lane layout = [Re (b,d) | Im (b,d)]

# -------- slab row offsets (all multiples of 8 -> clean sublane-aligned loads) -------
# activation slab (per-call), shape (64, 128)
_A_COND = 0                    # (2L, 128)  DFT RHS conditional block ([cond|0 ; 0|cond])
_A_XA = 2 * L                  # (F, 128)   [xr | xr]
_A_XB = _A_XA + F              # (F, 128)   [-xi | xi]
_A_TC = _A_XB + F              # (L, 128)   lanes 0:S_IN = tc, lane S_IN = 1.0
_A_ROWS = _A_TC + L            # 64

# narrow param slab (hoisted), shape (120, 32)
_N_W0 = 0                      # (8, H)   omega*w0 rows 0:4, omega*b0 row 4
_N_W1 = _N_W0 + _S_PAD         # (H, H)   omega*w1
_N_W2 = _N_W1 + H              # (H, H)   omega*w2
_N_W3 = _N_W2 + H              # (H, D)   w3
_N_B = _N_W3 + H               # (8, H)   rows: omega*b1, omega*b2, b3
_N_DFT = _N_B + 8              # (F, 2L)  [cos | -sin]
_N_ROWS = _N_DFT + F           # 120

# wide param slab (hoisted), shape (312, 128)
_W_W1 = 0                      # (128,128) CV_MLP layer-1 complex-block, batch-block-diag
_W_W2 = LANES                  # (128,128) CV_MLP layer-2
_W_S1 = 2 * LANES              # (F,128)   [sr|sr]
_W_S2 = _W_S1 + F              # (F,128)   [-si|si]
_W_BC = _W_S2 + F              # (F,128)   [br|bi]
_W_MASK = _W_BC + F            # (2L,128)  DFT-RHS placement mask for f_x
_W_ROWS = _W_MASK + 2 * L      # 312


# ------------------------------- Pallas kernel ------------------------------
def inff_kernel(act_ref, nar_ref, wide_ref, out_ref):
    f32 = jnp.float32

    # --- 1. SIREN implicit network (batch-invariant -> computed exactly once) ---
    # omega pre-scaled into w0..w2 / b1..b2 at pack time; layer-0 bias folded via the
    # ones-lane of tc, so the serial chain is just matmul -> (+bias) -> sin.
    tc_aug = act_ref[_A_TC:_A_TC + L, 0:_S_PAD]                          # (L, 8)
    w0 = nar_ref[_N_W0:_N_W0 + _S_PAD, :]
    w1 = nar_ref[_N_W1:_N_W1 + H, :]
    w2 = nar_ref[_N_W2:_N_W2 + H, :]
    w3 = nar_ref[_N_W3:_N_W3 + H, :]
    bias = nar_ref[_N_B:_N_B + 8, :]                                      # rows 0..2 used

    h = jnp.sin(jnp.dot(tc_aug, w0, preferred_element_type=f32))
    h = jnp.sin(jnp.dot(h, w1, preferred_element_type=f32) + bias[0:1, :])
    h = jnp.sin(jnp.dot(h, w2, preferred_element_type=f32) + bias[1:2, :])
    f_x = jnp.dot(h, w3, preferred_element_type=f32) + bias[2:3, :]       # (L, D)

    # --- 2. InstanceNorm over time (affine=False); E[x^2]-mu^2 -> independent reduces
    mu = jnp.mean(f_x, axis=0, keepdims=True)
    ex2 = jnp.mean(f_x * f_x, axis=0, keepdims=True)
    f_x = (f_x - mu) * lax.rsqrt(ex2 - mu * mu + EPS)

    # --- 3+4. fold f_x into the conditional and DFT the sum with ONE matmul whose
    # output is already in the lane-dense (F, B*2D) layout (lanes [Re | Im]).
    fx2 = jnp.concatenate([f_x, f_x], axis=1)                             # (L, 2D) batch tile
    fx4 = jnp.concatenate([fx2, fx2], axis=1)                             # (L, 4D)
    fx_full = jnp.concatenate([fx4, fx4], axis=0)                         # (2L, 4D)
    rhs = act_ref[_A_COND:_A_COND + 2 * L, :] \
        + fx_full * wide_ref[_W_MASK:_W_MASK + 2 * L, :]                  # (2L, 128)
    dft_lhs = nar_ref[_N_DFT:_N_DFT + F, :]                               # (F, 2L) = [cos|-sin]
    f = jnp.dot(dft_lhs, rhs, preferred_element_type=f32)                 # (F, 128)

    # --- 5. complex scale & bias: a half-width lane roll swaps Re/Im halves (XLU) ---
    g = f * wide_ref[_W_S1:_W_S1 + F, :] \
        + pltpu.roll(f, B * D, axis=1) * wide_ref[_W_S2:_W_S2 + F, :] \
        + wide_ref[_W_BC:_W_BC + F, :]

    # --- 6. CV_MLP: one (8,128)@(128,128) MXU push per complex layer -------------
    h1 = jnp.maximum(
        jnp.dot(g, wide_ref[_W_W1:_W_W1 + LANES, :], preferred_element_type=f32), 0.0)
    ff = jnp.dot(h1, wide_ref[_W_W2:_W_W2 + LANES, :], preferred_element_type=f32)

    # --- 7. complex multiply with x; single unmasked lane-dense (8,128) store ----
    out_ref[...] = act_ref[_A_XA:_A_XA + F, :] * ff \
        + act_ref[_A_XB:_A_XB + F, :] * pltpu.roll(ff, B * D, axis=1)


# ------------------ one-time (hoisted) parameter packing ---------------------
def pack_inff_params(params):
    """Pack all call-invariant parameters into two aligned slabs. Call ONCE."""
    (w0, b0, w1, b1, w2, b2, w3, b3,
     sr, si, br, bi, m1r, m1i, m2r, m2i) = params
    f32 = jnp.float32

    # narrow slab (120, 32): SIREN (omega pre-scaled, layer-0 bias folded) + DFT LHS
    w0_blk = (jnp.zeros((_S_PAD, H), f32)
              .at[0:S_IN, :].set(OMEGA * w0)
              .at[S_IN, :].set(OMEGA * b0[0]))
    bias_blk = (jnp.zeros((8, H), f32)
                .at[0, :].set(OMEGA * b1[0])
                .at[1, :].set(OMEGA * b2[0])
                .at[2, :].set(b3[0]))
    kk, tt = np.meshgrid(np.arange(F), np.arange(L), indexing="ij")
    ang = 2.0 * np.pi * kk * tt / L
    dft_lhs = jnp.asarray(np.concatenate([np.cos(ang), -np.sin(ang)], axis=1), f32)  # (F,2L)
    narrow = jnp.concatenate([w0_blk, OMEGA * w1, OMEGA * w2, w3, bias_blk, dft_lhs],
                             axis=0)                                      # (120, 32)

    # wide slab (312, 128)
    def blkdiag(m):                       # batch-shared weight -> block-diag over batch
        z = jnp.zeros_like(m)
        return jnp.concatenate([jnp.concatenate([m, z], axis=1),
                                jnp.concatenate([z, m], axis=1)], axis=0)

    def cplx_block(wr, wi):               # [gr|gi] @ [[Wr,Wi],[-Wi,Wr]] = [hr|hi]
        return jnp.concatenate([jnp.concatenate([wr, wi], axis=1),
                                jnp.concatenate([-wi, wr], axis=1)], axis=0)

    W1_big = cplx_block(blkdiag(m1r), blkdiag(m1i))                       # (128,128)
    W2_big = cplx_block(blkdiag(m2r), blkdiag(m2i))                       # (128,128)

    srt = jnp.tile(sr[:F], (1, B)); sit = jnp.tile(si[:F], (1, B))        # pre-truncated
    brt = jnp.tile(br[:F], (1, B)); bit = jnp.tile(bi[:F], (1, B))
    s1 = jnp.concatenate([srt, srt], axis=1)                              # (F,128)
    s2 = jnp.concatenate([-sit, sit], axis=1)
    bc = jnp.concatenate([brt, bit], axis=1)

    mask = np.zeros((2 * L, LANES), np.float32)                           # f_x placement mask
    mask[0:L, 0:B * D] = 1.0              # cos rows feed the Re lane half
    mask[L:2 * L, B * D:LANES] = 1.0      # -sin rows feed the Im lane half
    wide = jnp.concatenate([W1_big, W2_big, s1, s2, bc, jnp.asarray(mask)], axis=0)
    return narrow, wide                                                   # (120,32),(312,128)


# ------------------------------- forward wrapper ------------------------------
def _inff_forward(tc, cond, xr, xi, narrow, wide):
    f32 = jnp.float32
    # per-call activation packing only (layout plumbing; fuses into a couple of HLOs)
    cond_all = jnp.transpose(cond, (1, 0, 2)).reshape(L, B * D)           # (L, B*D)
    z = jnp.zeros((L, B * D), f32)
    cond_pack = jnp.concatenate(
        [jnp.concatenate([cond_all, z], axis=1),
         jnp.concatenate([z, cond_all], axis=1)], axis=0)                 # (2L, 128)
    xr_all = jnp.transpose(xr, (1, 0, 2)).reshape(F, B * D)
    xi_all = jnp.transpose(xi, (1, 0, 2)).reshape(F, B * D)
    x_a = jnp.concatenate([xr_all, xr_all], axis=1)                       # (F, 128)
    x_b = jnp.concatenate([-xi_all, xi_all], axis=1)                      # (F, 128)
    tc_row = (jnp.zeros((L, LANES), f32)
              .at[:, 0:S_IN].set(tc)
              .at[:, S_IN].set(1.0))                                      # ones-lane -> bias fold
    act = jnp.concatenate([cond_pack, x_a, x_b, tc_row], axis=0)          # (64, 128)

    def full_spec(shape):
        n = len(shape)
        return pl.BlockSpec(shape, lambda *_: (0,) * n)

    out_slab = pl.pallas_call(
        inff_kernel,
        in_specs=[full_spec((_A_ROWS, LANES)),    # activations slab
                  full_spec((_N_ROWS, H)),        # narrow param slab (SIREN + DFT)
                  full_spec((_W_ROWS, LANES))],   # wide param slab
        out_specs=full_spec((F, LANES)),
        out_shape=jax.ShapeDtypeStruct((F, LANES), f32),
    )(act, narrow, wide)

    # unpack lane-dense slab (consumers could take the (F,128) slab directly instead)
    out = out_slab.reshape(F, 2, B, D)            # lane = part*(B*D) + b*D + d
    out_r = jnp.transpose(out[:, 0], (1, 0, 2))   # (B, F, D)
    out_i = jnp.transpose(out[:, 1], (1, 0, 2))
    return out_r, out_i


inff_forward = jax.jit(_inff_forward)


# --------------------------- pure-JAX reference -------------------------------
def inff_reference(tc, cond, xr, xi, params):
    (w0, b0, w1, b1, w2, b2, w3, b3,
     sr, si, br, bi, m1r, m1i, m2r, m2i) = params
    h = jnp.sin(OMEGA * (tc @ w0 + b0))
    h = jnp.sin(OMEGA * (h @ w1 + b1))
    h = jnp.sin(OMEGA * (h @ w2 + b2))
    f_x = h @ w3 + b3
    mu = f_x.mean(0, keepdims=True)
    var = ((f_x - mu) ** 2).mean(0, keepdims=True)
    f_x = (f_x - mu) / jnp.sqrt(var + EPS)
    f_x = f_x[None] + cond                                    # (B, L, D)
    Fc = jnp.fft.rfft(f_x, axis=1)                            # (B, F_BASE, D) complex
    Fc = Fc * (sr + 1j * si) + (br + 1j * bi)
    W1 = m1r + 1j * m1i
    W2 = m2r + 1j * m2i
    h1 = Fc @ W1
    h1 = jnp.maximum(h1.real, 0.0) + 1j * jnp.maximum(h1.imag, 0.0)
    Fo = (h1 @ W2)[:, :FREQ_SPAN, :]
    out = (xr + 1j * xi) * Fo
    return out.real.astype(jnp.float32), out.imag.astype(jnp.float32)


# ----------------------------------- main -------------------------------------
if __name__ == "__main__":
    key = jax.random.PRNGKey(0)
    ks = jax.random.split(key, 24)

    def u(k, shape, lim):
        return jax.random.uniform(k, shape, jnp.float32, -lim, lim)

    # SIREN weights (deterministic, SIREN-style init)
    lim_mid = float(np.sqrt(6.0 / H) / OMEGA)
    w0 = u(ks[0], (S_IN, H), 1.0 / S_IN)
    b0 = u(ks[1], (1, H), 1.0 / S_IN)
    w1 = u(ks[2], (H, H), lim_mid)
    b1 = u(ks[3], (1, H), lim_mid)
    w2 = u(ks[4], (H, H), lim_mid)
    b2 = u(ks[5], (1, H), lim_mid)
    w3 = u(ks[6], (H, D), lim_mid)
    b3 = u(ks[7], (1, D), lim_mid)

    # lft_scale_bias (std_=1.0): complex scale & bias per (freq, channel), full f_base
    sr = jax.random.normal(ks[8], (F_BASE, D), jnp.float32)
    si = jax.random.normal(ks[9], (F_BASE, D), jnp.float32)
    br = jax.random.normal(ks[10], (F_BASE, D), jnp.float32)
    bi = jax.random.normal(ks[11], (F_BASE, D), jnp.float32)

    # CV_MLP complex weights (bias=False, factor=1, shared)
    wscale = 1.0 / np.sqrt(D)
    m1r = jax.random.normal(ks[12], (D, D), jnp.float32) * wscale
    m1i = jax.random.normal(ks[13], (D, D), jnp.float32) * wscale
    m2r = jax.random.normal(ks[14], (D, D), jnp.float32) * wscale
    m2i = jax.random.normal(ks[15], (D, D), jnp.float32) * wscale

    params = (w0, b0, w1, b1, w2, b2, w3, b3,
              sr, si, br, bi, m1r, m1i, m2r, m2i)

    # Inputs
    t = jnp.linspace(-1.0, 1.0, L)
    tc = jnp.stack([t, jnp.sin(jnp.pi * t), jnp.cos(jnp.pi * t), t ** 2], axis=-1)  # (L, S_IN)
    cond = jax.random.normal(ks[16], (B, L, D), jnp.float32)            # conditional
    xr = jax.random.normal(ks[17], (B, FREQ_SPAN, D), jnp.float32)      # x (freq domain), real
    xi = jax.random.normal(ks[18], (B, FREQ_SPAN, D), jnp.float32)      # x, imag

    # one-time hoisted parameter packing (NOT in the per-call path)
    narrow_slab, wide_slab = jax.block_until_ready(pack_inff_params(params))

    out_r, out_i = jax.block_until_ready(
        inff_forward(tc, cond, xr, xi, narrow_slab, wide_slab))
    ref_r, ref_i = inff_reference(tc, cond, xr, xi, params)

    np.testing.assert_allclose(np.asarray(out_r), np.asarray(ref_r), rtol=2e-2, atol=2e-2)
    np.testing.assert_allclose(np.asarray(out_i), np.asarray(ref_i), rtol=2e-2, atol=2e-2)
    print("KERNEL_OK")
</pallas_src>

<mosaic_0001>
module attributes {stable_mosaic.version = 11 : i64} {
  func.func @inff_kernel(%arg0: memref<64x128xf32, #tpu.memory_space<vmem>>, %arg1: memref<120x32xf32, #tpu.memory_space<vmem>>, %arg2: memref<312x128xf32, #tpu.memory_space<vmem>>, %arg3: memref<8x128xf32, #tpu.memory_space<vmem>>) attributes {dimension_semantics = [], scalar_prefetch = 0 : i64, scratch_operands = 0 : i64, tpu.core_type = #tpu.core_type<tc>} {
    %c48 = arith.constant 48 : index
    %c0 = arith.constant 0 : index
    %0 = vector.load %arg0[%c48, %c0] : memref<64x128xf32, #tpu.memory_space<vmem>>, vector<16x8xf32>
    %c0_0 = arith.constant 0 : index
    %c0_1 = arith.constant 0 : index
    %1 = vector.load %arg1[%c0_0, %c0_1] : memref<120x32xf32, #tpu.memory_space<vmem>>, vector<8x32xf32>
    %c8 = arith.constant 8 : index
    %c0_2 = arith.constant 0 : index
    %2 = vector.load %arg1[%c8, %c0_2] : memref<120x32xf32, #tpu.memory_space<vmem>>, vector<32x32xf32>
    %c40 = arith.constant 40 : index
    %c0_3 = arith.constant 0 : index
    %3 = vector.load %arg1[%c40, %c0_3] : memref<120x32xf32, #tpu.memory_space<vmem>>, vector<32x32xf32>
    %c72 = arith.constant 72 : index
    %c0_4 = arith.constant 0 : index
    %4 = vector.load %arg1[%c72, %c0_4] : memref<120x32xf32, #tpu.memory_space<vmem>>, vector<32x32xf32>
    %c104 = arith.constant 104 : index
    %c0_5 = arith.constant 0 : index
    %5 = vector.load %arg1[%c104, %c0_5] : memref<120x32xf32, #tpu.memory_space<vmem>>, vector<8x32xf32>
    %cst = arith.constant dense<0.000000e+00> : vector<16x32xf32>
    %6 = tpu.matmul %0, %1, %cst {dimension_numbers = #tpu.dot_dimension_numbers<[1], [0], [0], [1], [0, 0, 1, 1], [], []>} : vector<16x8xf32>, vector<8x32xf32>, vector<16x32xf32> -> vector<16x32xf32>
    %7 = math.sin %6 : vector<16x32xf32>
    %cst_6 = arith.constant dense<0.000000e+00> : vector<16x32xf32>
    %8 = tpu.matmul %7, %2, %cst_6 {dimension_numbers = #tpu.dot_dimension_numbers<[1], [0], [0], [1], [0, 0, 1, 1], [], []>} : vector<16x32xf32>, vector<32x32xf32>, vector<16x32xf32> -> vector<16x32xf32>
    %9 = vector.extract_strided_slice %5 {offsets = [0, 0], sizes = [1, 32], strides = [1, 1]} : vector<8x32xf32> to vector<1x32xf32>
    %10 = vector.broadcast %9 : vector<1x32xf32> to vector<16x32xf32>
    %11 = arith.addf %8, %10 : vector<16x32xf32>
    %12 = math.sin %11 : vector<16x32xf32>
    %cst_7 = arith.constant dense<0.000000e+00> : vector<16x32xf32>
    %13 = tpu.matmul %12, %3, %cst_7 {dimension_numbers = #tpu.dot_dimension_numbers<[1], [0], [0], [1], [0, 0, 1, 1], [], []>} : vector<16x32xf32>, vector<32x32xf32>, vector<16x32xf32> -> vector<16x32xf32>
    %14 = vector.extract_strided_slice %5 {offsets = [1, 0], sizes = [1, 32], strides = [1, 1]} : vector<8x32xf32> to vector<1x32xf32>
    %15 = vector.broadcast %14 : vector<1x32xf32> to vector<16x32xf32>
    %16 = arith.addf %13, %15 : vector<16x32xf32>
    %17 = math.sin %16 : vector<16x32xf32>
    %cst_8 = arith.constant dense<0.000000e+00> : vector<16x32xf32>
    %18 = tpu.matmul %17, %4, %cst_8 {dimension_numbers = #tpu.dot_dimension_numbers<[1], [0], [0], [1], [0, 0, 1, 1], [], []>} : vector<16x32xf32>, vector<32x32xf32>, vector<16x32xf32> -> vector<16x32xf32>
    %19 = vector.extract_strided_slice %5 {offsets = [2, 0], sizes = [1, 32], strides = [1, 1]} : vector<8x32xf32> to vector<1x32xf32>
    %20 = vector.broadcast %19 : vector<1x32xf32> to vector<16x32xf32>
    %21 = arith.addf %18, %20 : vector<16x32xf32>
    %cst_9 = arith.constant dense<0.000000e+00> : vector<32xf32>
    %22 = vector.multi_reduction <add>, %21, %cst_9 [0] : vector<16x32xf32> to vector<32xf32>
    %23 = vector.shape_cast %22 : vector<32xf32> to vector<1x32xf32>
    %cst_10 = arith.constant 1.600000e+01 : f32
    %24 = vector.broadcast %cst_10 : f32 to vector<1x32xf32>
    %25 = arith.divf %23, %24 : vector<1x32xf32>
    %26 = arith.mulf %21, %21 : vector<16x32xf32>
    %cst_11 = arith.constant dense<0.000000e+00> : vector<32xf32>
    %27 = vector.multi_reduction <add>, %26, %cst_11 [0] : vector<16x32xf32> to vector<32xf32>
    %28 = vector.shape_cast %27 : vector<32xf32> to vector<1x32xf32>
    %cst_12 = arith.constant 1.600000e+01 : f32
    %29 = vector.broadcast %cst_12 : f32 to vector<1x32xf32>
    %30 = arith.divf %28, %29 : vector<1x32xf32>
    %31 = vector.broadcast %25 : vector<1x32xf32> to vector<16x32xf32>
    %32 = arith.subf %21, %31 : vector<16x32xf32>
    %33 = arith.mulf %25, %25 : vector<1x32xf32>
    %34 = arith.subf %30, %33 : vector<1x32xf32>
    %cst_13 = arith.constant 9.99999974E-6 : f32
    %35 = vector.broadcast %cst_13 : f32 to vector<1x32xf32>
    %36 = arith.addf %34, %35 : vector<1x32xf32>
    %37 = math.rsqrt %36 : vector<1x32xf32>
    %38 = vector.broadcast %37 : vector<1x32xf32> to vector<16x32xf32>
    %39 = arith.mulf %32, %38 : vector<16x32xf32>
    %40 = tpu.concatenate %39, %39 in 1 : vector<16x32xf32>, vector<16x32xf32> -> vector<16x64xf32>
    %41 = tpu.concatenate %40, %40 in 1 : vector<16x64xf32>, vector<16x64xf32> -> vector<16x128xf32>
    %42 = tpu.concatenate %41, %41 in 0 : vector<16x128xf32>, vector<16x128xf32> -> vector<32x128xf32>
    %c0_14 = arith.constant 0 : index
    %c0_15 = arith.constant 0 : index
    %43 = vector.load %arg0[%c0_14, %c0_15] : memref<64x128xf32, #tpu.memory_space<vmem>>, vector<32x128xf32>
    %c280 = arith.constant 280 : index
    %c0_16 = arith.constant 0 : index
    %44 = vector.load %arg2[%c280, %c0_16] : memref<312x128xf32, #tpu.memory_space<vmem>>, vector<32x128xf32>
    %45 = arith.mulf %42, %44 : vector<32x128xf32>
    %46 = arith.addf %43, %45 : vector<32x128xf32>
    %c112 = arith.constant 112 : index
    %c0_17 = arith.constant 0 : index
    %47 = vector.load %arg1[%c112, %c0_17] : memref<120x32xf32, #tpu.memory_space<vmem>>, vector<8x32xf32>
    %cst_18 = arith.constant dense<0.000000e+00> : vector<8x128xf32>
    %48 = tpu.matmul %47, %46, %cst_18 {dimension_numbers = #tpu.dot_dimension_numbers<[1], [0], [0], [1], [0, 0, 1, 1], [], []>} : vector<8x32xf32>, vector<32x128xf32>, vector<8x128xf32> -> vector<8x128xf32>
    %c256 = arith.constant 256 : index
    %c0_19 = arith.constant 0 : index
    %49 = vector.load %arg2[%c256, %c0_19] : memref<312x128xf32, #tpu.memory_space<vmem>>, vector<8x128xf32>
    %50 = arith.mulf %48, %49 : vector<8x128xf32>
    %c64_i32 = arith.constant 64 : i32
    %51 = tpu.dynamic_rotate %48 by %c64_i32 dim 1 : vector<8x128xf32>, i32 -> vector<8x128xf32>
    %c264 = arith.constant 264 : index
    %c0_20 = arith.constant 0 : index
    %52 = vector.load %arg2[%c264, %c0_20] : memref<312x128xf32, #tpu.memory_space<vmem>>, vector<8x128xf32>
    %53 = arith.mulf %51, %52 : vector<8x128xf32>
    %54 = arith.addf %50, %53 : vector<8x128xf32>
    %c272 = arith.constant 272 : index
    %c0_21 = arith.constant 0 : index
    %55 = vector.load %arg2[%c272, %c0_21] : memref<312x128xf32, #tpu.memory_space<vmem>>, vector<8x128xf32>
    %56 = arith.addf %54, %55 : vector<8x128xf32>
    %c0_22 = arith.constant 0 : index
    %c0_23 = arith.constant 0 : index
    %57 = vector.load %arg2[%c0_22, %c0_23] : memref<312x128xf32, #tpu.memory_space<vmem>>, vector<128x128xf32>
    %cst_24 = arith.constant dense<0.000000e+00> : vector<8x128xf32>
    %58 = tpu.matmul %56, %57, %cst_24 {dimension_numbers = #tpu.dot_dimension_numbers<[1], [0], [0], [1], [0, 0, 1, 1], [], []>} : vector<8x128xf32>, vector<128x128xf32>, vector<8x128xf32> -> vector<8x128xf32>
    %cst_25 = arith.constant 0.000000e+00 : f32
    %59 = vector.broadcast %cst_25 : f32 to vector<8x128xf32>
    %60 = arith.maximumf %58, %59 : vector<8x128xf32>
    %c128 = arith.constant 128 : index
    %c0_26 = arith.constant 0 : index
    %61 = vector.load %arg2[%c128, %c0_26] : memref<312x128xf32, #tpu.memory_space<vmem>>, vector<128x128xf32>
    %cst_27 = arith.constant dense<0.000000e+00> : vector<8x128xf32>
    %62 = tpu.matmul %60, %61, %cst_27 {dimension_numbers = #tpu.dot_dimension_numbers<[1], [0], [0], [1], [0, 0, 1, 1], [], []>} : vector<8x128xf32>, vector<128x128xf32>, vector<8x128xf32> -> vector<8x128xf32>
    %c32 = arith.constant 32 : index
    %c0_28 = arith.constant 0 : index
    %63 = vector.load %arg0[%c32, %c0_28] : memref<64x128xf32, #tpu.memory_space<vmem>>, vector<8x128xf32>
    %64 = arith.mulf %63, %62 : vector<8x128xf32>
    %c40_29 = arith.constant 40 : index
    %c0_30 = arith.constant 0 : index
    %65 = vector.load %arg0[%c40_29, %c0_30] : memref<64x128xf32, #tpu.memory_space<vmem>>, vector<8x128xf32>
    %c64_i32_31 = arith.constant 64 : i32
    %66 = tpu.dynamic_rotate %62 by %c64_i32_31 dim 1 : vector<8x128xf32>, i32 -> vector<8x128xf32>
    %67 = arith.mulf %65, %66 : vector<8x128xf32>
    %68 = arith.addf %64, %67 : vector<8x128xf32>
    %c0_32 = arith.constant 0 : index
    %c0_33 = arith.constant 0 : index
    %69 = vector.load %arg3[%c0_32, %c0_33] : memref<8x128xf32, #tpu.memory_space<vmem>>, vector<8x128xf32>
    tpu.vector_store %arg3[%c0_32, %c0_33], %68 {strides = array<i32>} : memref<8x128xf32, #tpu.memory_space<vmem>>, vector<8x128xf32>,
    return
  }
}

</mosaic_0001>

<bundles_post_ra>
// kernel: neg.1
= control target key start
LH: loop header
LB: loop body
LE: loop exit
PB: predicated region body
PF: predicated region fallthrough
CT: control target
= control target key end

     0   :  { %s24_s0 = inlined_call_operand.vmem [shape: f32[8,64], index: 0, kind: input, shape index: {}]   ;;  %s25_s1 = inlined_call_operand.vmem [shape: f32[8,64], index: 1, kind: output, shape index: {}]  }
   0x1   :  { %v2_v0 = vld [vmem:[%s24_s0] sm:$0xff] }
   0x2   :  { %v5_v1 = vxor.u32 2147483648, %v2_v0 }
   0x4   :  { %7 = vst [vmem:[%s25_s1] sm:$0xff] %v5_v1 }

// kernel: _inff_forward.1
= control target key start
LH: loop header
LB: loop body
LE: loop exit
PB: predicated region body
PF: predicated region fallthrough
CT: control target
= control target key end

     0   :  { %vm30_vm0 = vcmask 64512   ;;  %v1600_v27 = vmov 683565275   ;;  %v1601_v30 = vmov 2475754826   ;;  %s1606_s17 = smov 32   ;;  %s2176_s1 = inlined_call_operand.vmem [shape: f32[120,32], index: 1, kind: input, shape index: {}]   ;;  %s2177_s0 = inlined_call_operand.vmem [shape: f32[64,128], index: 0, kind: input, shape index: {}]   ;;  %s2178_s2 = inlined_call_operand.vmem [shape: f32[312,128], index: 2, kind: input, shape index: {}]   ;;  %s2179_s3 = inlined_call_operand.vmem [shape: f32[8,128], index: 3, kind: output, shape index: {}]  }
   0x1   :  { %v16_v0 = vld [vmem:[%s2176_s1] sm:$0xff]  ;;  %v14_v1 = vld [vmem:[%s2177_s0 + $0x30] sm:$0xff]  ;;  %v15_v2 = vld [vmem:[%s2177_s0 + $0x38] sm:$0xff]  ;;  %v1602_v32 = vmov 2131351028   ;;  %s1608_s18 = smov 64  }
   0x2   :  { %1421 = vmatprep.subr.mxu0 %v16_v0  ;;  %1423 = vmatprep.mubr.msk.f32.mxu0 %vm30_vm0, %v14_v1  ;;  %v20_v3 = vld [vmem:[%s2176_s1 + $0x20] sm:$0xff]  ;;  %v19_v4 = vld [vmem:[%s2176_s1 + $0x18] sm:$0xff]  ;;  %v18_v5 = vld [vmem:[%s2176_s1 + $0x10] sm:$0xff]  ;;  %v1603_v34 = vmov 2102212464  }
   0x3   :  { %1422 = vmatpush3.msra.mxu0 %v16_v0  ;;  %1426 = vmatprep.subr.mxu1 %v20_v3  ;;  %v17_v6 = vld [vmem:[%s2176_s1 + $0x8] sm:$0xff]  ;;  %v1604_v36 = vmov 920167782   ;;  %v1605_v43 = vmov 1326507024  }
   0x4   :  { %1424 = vmatmul.mubr.msk.f32.vlgmr.msra.gmra.mxu0 %vm30_vm0, %v15_v2  ;;  %1427 = vmatpush3.msra.mxu1 %v20_v3 }
   0x5   :  { %1428 = vmatprep.subr.mxu1 %v19_v4 }
   0x6   :  { %1429 = vmatpush3.msra.mxu1 %v19_v4 }
   0x7   :  { %1430 = vmatprep.subr.mxu1 %v18_v5 }
   0x8   :  { %1431 = vmatpush3.msra.mxu1 %v18_v5 }
   0x9   :  { %1432 = vmatprep.subr.mxu1 %v17_v6 }
   0xa   :  { %1433 = vmatpush3.msra.mxu1 %v17_v6 }
  0xc4   :  { %v1651_v7 = vpop.f32.mrf.mxu0 }
  0xc5   :  { %v216_v8 = vand.u32 2147483647, %v1651_v7  ;;  %v219_v9 = vand.u32 2139095040, %v1651_v7  ;;  %vm218_vm15 = vcmp.lt.s32.totalorder %v1651_v7, 0 }
  0xc6   :  { %v1655_v10 = vpop.f32.mrf.mxu0 }
  0xc7   :  { %v220_v11 = vshrl.u32 %v219_v9, 23  ;;  %v223_v12 = vand.u32 8388607, %v216_v8  ;;  %v115_v13 = vand.u32 2139095040, %v1655_v10  ;;  %v112_v15 = vand.u32 2147483647, %v1655_v10 }
  0xc8   :  { %vm1728_vm0 = vcmp.le.f32.partialorder %v216_v8, 0.7853982 }
  0xc9   :  { %v1334_v14 = vadd.s32 4294967169, %v220_v11  ;;  %v116_v16 = vshrl.u32 %v115_v13, 23  ;;  %v224_v18 = vor.u32 8388608, %v223_v12  ;;  %v119_v20 = vand.u32 8388607, %v112_v15 }
  0xcb   :  { %v226_v17 = vadd.s32 1, %v1334_v14  ;;  %v1330_v19 = vadd.s32 4294967169, %v116_v16  ;;  %v1663_v25 = vshll.u32 %v224_v18, 8  ;;  %v120_v29 = vor.u32 8388608, %v119_v20 }
  0xcd   :  { %vm227_vm1 = vcmp.gt.s32.totalorder %v226_v17, 0  ;;  %v122_v22 = vadd.s32 1, %v1330_v19  ;;  %v160_v62 = vshll.u32 %v120_v29, 8 }
  0xce   :  { %v228_v21 = vsel %vm227_vm1, %v226_v17, 0  ;;  %vm114_vm1 = vcmp.lt.s32.totalorder %v1655_v10, 0 }
  0xcf   :  { %v229_v23 = vshrl.u32 %v228_v21, 5  ;;  %v230_v24 = vand.u32 31, %v228_v21  ;;  %vm123_vm2 = vcmp.gt.s32.totalorder %v122_v22, 0 }
  0xd0   :  { %v124_v48 = vsel %vm123_vm2, %v122_v22, 0  ;;  %vm113_vm2 = vcmp.le.f32.partialorder %v112_v15, 0.7853982 }
  0xd1   :  { %v231_v26 = vsub.s32 32, %v230_v24  ;;  %v233_v28 = vshll.u32 %v1600_v27, %v230_v24  ;;  %v236_v31 = vshll.u32 %v1601_v30, %v230_v24  ;;  %v239_v33 = vshll.u32 %v1602_v32, %v230_v24 }
  0xd2   :  { %v242_v35 = vshll.u32 %v1603_v34, %v230_v24  ;;  %v245_v37 = vshll.u32 %v1604_v36, %v230_v24  ;;  %vm248_vm3 = vcmp.lt.s32.totalorder %v229_v23, 1  ;;  %vm250_vm4 = vcmp.lt.s32.totalorder %v229_v23, 3 }
  0xd3   :  { %v234_v38 = vshrl.u32 %v1601_v30, %v231_v26  ;;  %v237_v39 = vshrl.u32 %v1602_v32, %v231_v26  ;;  %v240_v40 = vshrl.u32 %v1603_v34, %v231_v26  ;;  %v232_v41 = vshrl.u32 %v1600_v27, %v231_v26 }
  0xd4   :  { %v243_v42 = vshrl.u32 %v1604_v36, %v231_v26  ;;  %v246_v44 = vshrl.u32 %v1605_v43, %v231_v26  ;;  %vm251_vm5 = vcmp.lt.s32.totalorder %v229_v23, 4  ;;  %v126_v51 = vand.u32 31, %v124_v48 }
  0xd5   :  { %v235_v45 = vor.u32 %v234_v38, %v233_v28  ;;  %v238_v46 = vor.u32 %v237_v39, %v236_v31  ;;  %v241_v47 = vor.u32 %v240_v40, %v239_v33  ;;  %vm249_vm6 = vcmp.lt.s32.totalorder %v229_v23, 2 }
  0xd6   :  { %v244_v49 = vor.u32 %v243_v42, %v242_v35  ;;  %v247_v50 = vor.u32 %v246_v44, %v245_v37  ;;  %v127_v59 = vsub.s32 32, %v126_v51  ;;  %v125_v2 = vshrl.u32 %v124_v48, 5 }
  0xd7   :  { %v252_v52 = vsel %vm248_vm3, %v232_v41, %v235_v45  ;;  %v253_v53 = vsel %vm251_vm5, %v241_v47, 2102212464  ;;  %v256_v54 = vsel %vm248_vm3, %v235_v45, %v238_v46  ;;  %v260_v55 = vsel %vm248_vm3, %v238_v46, %v241_v47 }
  0xd8   :  { %v254_v56 = vsel %vm250_vm4, %v238_v46, %v253_v53  ;;  %v257_v57 = vsel %vm251_vm5, %v244_v49, 920167782  ;;  %v261_v58 = vsel %vm251_vm5, %v247_v50, 1326507024  ;;  %v129_v9 = vshll.u32 %v1600_v27, %v126_v51 }
  0xd9   :  { %v258_v60 = vsel %vm250_vm4, %v241_v47, %v257_v57  ;;  %v262_v61 = vsel %vm250_vm4, %v244_v49, %v261_v58  ;;  %v255_v63 = vsel %vm249_vm6, %v252_v52, %v254_v56  ;;  %v130_v11 = vshrl.u32 %v1601_v30, %v127_v59 }
  0xda   :  { %v259_v0 = vsel %vm249_vm6, %v256_v54, %v258_v60  ;;  %v263_v1 = vsel %vm249_vm6, %v260_v55, %v262_v61  ;;  %v132_v12 = vshll.u32 %v1601_v30, %v126_v51  ;;  %v133_v13 = vshrl.u32 %v1602_v32, %v127_v59 }
  0xdb   :  { %v1684_v3 = vmul.u32.u64.low %v1663_v25, %v263_v1  ;;  %v1685_v4 = vmul.u32.u64.high %v1663_v25, %v263_v1, %v1684_v3  ;;  %v1688_v5 = vmul.u32.u64.low %v1663_v25, %v259_v0  ;;  %v1689_v6 = vmul.u32.u64.high %v1663_v25, %v259_v0, %v1688_v5 }
  0xdc   :  { %v135_v14 = vshll.u32 %v1602_v32, %v126_v51  ;;  %v136_v16 = vshrl.u32 %v1603_v34, %v127_v59  ;;  %v138_v17 = vshll.u32 %v1603_v34, %v126_v51  ;;  %v139_v18 = vshrl.u32 %v1604_v36, %v127_v59 }
  0xdd   :  { %v131_v19 = vor.u32 %v130_v11, %v129_v9  ;;  %v134_v20 = vor.u32 %v133_v13, %v132_v12  ;;  %v141_v21 = vshll.u32 %v1604_v36, %v126_v51  ;;  %v142_v22 = vshrl.u32 %v1605_v43, %v127_v59 }
  0xde   :  { %v271_v23 = vmul.u32 %v1663_v25, %v255_v63  ;;  %vm273_vm7 = vc.u32 %v1685_v4, %v1688_v5  ;;  %v274_v24 = vadd.s32 1, %v1689_v6  ;;  %v137_v26 = vor.u32 %v136_v16, %v135_v14 }
  0xdf   :  { %v128_v28 = vshrl.u32 %v1600_v27, %v127_v59  ;;  %v140_v29 = vor.u32 %v139_v18, %v138_v17  ;;  %v143_v31 = vor.u32 %v142_v22, %v141_v21  ;;  %vm144_vm8 = vcmp.lt.s32.totalorder %v125_v2, 1 }
  0xe0   :  { %v275_v33 = vsel %vm273_vm7, %v274_v24, %v1689_v6  ;;  %vm146_vm9 = vcmp.lt.s32.totalorder %v125_v2, 3  ;;  %vm147_vm10 = vcmp.lt.s32.totalorder %v125_v2, 4  ;;  %v152_v35 = vsel %vm144_vm8, %v131_v19, %v134_v20 }
  0xe1   :  { %v276_v37 = vadd.s32 %v275_v33, %v271_v23  ;;  %v149_v38 = vsel %vm147_vm10, %v137_v26, 2102212464  ;;  %v153_v39 = vsel %vm147_vm10, %v140_v29, 920167782  ;;  %v156_v25 = vsel %vm144_vm8, %v134_v20, %v137_v26 }
  0xe2   :  { %vm145_vm11 = vcmp.lt.s32.totalorder %v125_v2, 2  ;;  %v148_v40 = vsel %vm144_vm8, %v128_v28, %v131_v19  ;;  %v154_v41 = vsel %vm146_vm9, %v137_v26, %v153_v39  ;;  %v157_v42 = vsel %vm147_vm10, %v143_v31, 1326507024 }
  0xe3   :  { %v277_v44 = vadd.s32 536870912, %v276_v37  ;;  %v150_v45 = vsel %vm146_vm9, %v134_v20, %v149_v38  ;;  %v155_v46 = vsel %vm145_vm11, %v152_v35, %v154_v41  ;;  %v158_v47 = vsel %vm146_vm9, %v140_v29, %v157_v42 }
  0xe4   :  { %v159_v48 = vsel %vm145_vm11, %v156_v25, %v158_v47  ;;  %v1708_v49 = vmul.u32.u64.low %v160_v62, %v155_v46  ;;  %v1709_v50 = vmul.u32.u64.high %v160_v62, %v155_v46, %v1708_v49  ;;  %v151_v54 = vsel %vm145_vm11, %v148_v40, %v150_v45 }
  0xe5   :  { %v1711_v51 = vshrl.u32 %v277_v44, 30  ;;  %v1713_v52 = vmul.u32.u64.low %v160_v62, %v159_v48  ;;  %v1714_v53 = vmul.u32.u64.high %v160_v62, %v159_v48, %v1713_v52  ;;  %v167_v58 = vmul.u32 %v160_v62, %v151_v54 }
  0xe6   :  { %v170_v56 = vadd.s32 1, %v1709_v50  ;;  %v272_v12 = vadd.s32 %v1688_v5, %v1685_v4  ;;  %vm324_vm9 = vcmask 261120   ;;  %vm204_vm10 = vweird.f32 %v1655_v10 }
  0xe7   :  { %v279_v55 = vshll.u32 %v1711_v51, 30  ;;  %vm169_vm12 = vc.u32 %v1714_v53, %v1708_v49  ;;  %v168_v33 = vadd.s32 %v1708_v49, %v1714_v53  ;;  %v302_v49 = vsub.s32 4, %v1711_v51 }
  0xe8   :  { %v171_v59 = vsel %vm169_vm12, %v170_v56, %v1709_v50  ;;  %vm308_vm11 = vweird.f32 %v1651_v7 }
  0xe9   :  { %v280_v57 = vsub.s32 %v276_v37, %v279_v55  ;;  %v172_v61 = vadd.s32 %v171_v59, %v167_v58  ;;  %v303_v53 = vsel %vm218_vm15, %v302_v49, %v1711_v51 }
  0xea   :  { %v305_v56 = vsel %vm1728_vm0, 0, %v303_v53 }
  0xeb   :  { %v282_v60 = vsub.s32 0, %v280_v57  ;;  %v173_v0 = vadd.s32 536870912, %v172_v61  ;;  %v309_v58 = vadd.s32 3, %v305_v56 }
  0xed   :  { %v1335_v63 = vmin.u32 %v282_v60, %v280_v57  ;;  %v174_v2 = vshrl.u32 %v173_v0, 30 }
  0xef   :  { %v284_v1 = vclz %v1335_v63  ;;  %v175_v6 = vshll.u32 %v174_v2, 30  ;;  %v198_v52 = vsub.s32 4, %v174_v2  ;;  %v310_v63 = vand.u32 3, %v309_v58 }
  0xf1   :  { %v1336_v3 = vadd.s32 4294967294, %v284_v1  ;;  %v176_v9 = vsub.s32 %v172_v61, %v175_v6  ;;  %v199_v55 = vsel %vm114_vm1, %v198_v52, %v174_v2  ;;  %vm312_vm3 = vcmp.eq.s32.totalorder %v310_v63, 0 }
  0xf2   :  { %vm315_vm4 = vcmp.eq.s32.totalorder %v310_v63, 2  ;;  %vm311_vm7 = vcmp.lt.s32.totalorder %v310_v63, 2 }
  0xf3   :  { %vm1337_vm13 = vcmp.lt.s32.totalorder %v1336_v3, 0  ;;  %v178_v14 = vsub.s32 0, %v176_v9 }
  0xf4   :  { %v287_v11 = vsel %vm1337_vm13, 0, %v1336_v3 }
  0xf5   :  { %v288_v13 = vsub.s32 32, %v287_v11  ;;  %v292_v62 = vsub.s32 4294967266, %v287_v11  ;;  %v289_v16 = vshll.u32 %v280_v57, %v287_v11  ;;  %v1331_v19 = vmin.u32 %v178_v14, %v176_v9 }
  0xf6   :  { %v201_v57 = vsel %vm113_vm2, 0, %v199_v55 }
  0xf7   :  { %v290_v17 = vshrl.u32 %v272_v12, %v288_v13  ;;  %v293_v18 = vadd.s32 127, %v292_v62  ;;  %v180_v22 = vclz %v1331_v19  ;;  %v205_v61 = vadd.s32 3, %v201_v57  ;;  %v23_v19 = vld [vmem:[%s2176_s1 + $0x38] sm:$0xff] }
  0xf9   :  { %v291_v20 = vor.u32 %v290_v17, %v289_v16  ;;  %v294_v21 = vshll.u32 %v293_v18, 23  ;;  %v1332_v24 = vadd.s32 4294967294, %v180_v22  ;;  %v206_v1 = vand.u32 3, %v205_v61  ;;  %v24_v18 = vld [vmem:[%s2176_s1 + $0x40] sm:$0xff] }
  0xfa   :  { %1437 = vmatprep.subr.mxu0 %v24_v18 }
  0xfb   :  { %v295_v23 = vor.u32 4788187, %v294_v21  ;;  %v298_v28 = vcvt.s32.f32 %v291_v20  ;;  %vm1333_vm14 = vcmp.lt.s32.totalorder %v1332_v24, 0  ;;  %vm211_vm5 = vcmp.eq.s32.totalorder %v206_v1, 2  ;;  %1438 = vmatpush3.msra.mxu0 %v24_v18 }
  0xfc   :  { %v183_v29 = vsel %vm1333_vm14, 0, %v1332_v24  ;;  %vm208_vm6 = vcmp.eq.s32.totalorder %v206_v1, 0  ;;  %vm207_vm8 = vcmp.lt.s32.totalorder %v206_v1, 2  ;;  %1439 = vmatprep.subr.mxu0 %v23_v19  ;;  %v320_v20 = vlaneseq }
  0xfd   :  { %v296_v26 = vand.u32 2147483647, %v295_v23  ;;  %v184_v4 = vsub.s32 32, %v183_v29  ;;  %v188_v5 = vsub.s32 4294967266, %v183_v29  ;;  %v185_v37 = vshll.u32 %v176_v9, %v183_v29  ;;  %1440 = vmatpush3.msra.mxu0 %v23_v19  ;;  %v1767_v23 = vld [vmem:[%s2176_s1 + $0x68] sm:$0xff] }
  0xfe   :  { %v1761_v21 = vshrl.u32 %v320_v20, 7 }
  0xff   :  { %v299_v31 = vmul.f32 %v298_v28, %v296_v26  ;;  %v186_v38 = vshrl.u32 %v168_v33, %v184_v4  ;;  %v189_v39 = vadd.s32 127, %v188_v5 }
 0x100   :  { %v322_v22 = vsub.s32 0, %v1761_v21 }
 0x101   :  { %v300_v35 = vxor.u32 2147483648, %v299_v31  ;;  %v187_v40 = vor.u32 %v186_v38, %v185_v37  ;;  %v190_v41 = vshll.u32 %v189_v39, 23 }
 0x102   :  { %v323_v24 = vrot.slane %v1767_v23, %v322_v22 }
 0x103   :  { %v301_v25 = vsel %vm218_vm15, %v300_v35, %v299_v31  ;;  %v191_v45 = vor.u32 4788187, %v190_v41  ;;  %v194_v47 = vcvt.s32.f32 %v187_v40 }
 0x104   :  { %v304_v44 = vsel %vm1728_vm0, %v1651_v7, %v301_v25  ;;  %v21_v7 = vld [vmem:[%s2176_s1 + $0x28] sm:$0xff] }
 0x105   :  { %v192_v46 = vand.u32 2147483647, %v191_v45  ;;  %1574 = vcosq.f32 %v304_v44 }
 0x106   :  { %1576 = vsinq.f32 %v304_v44 }
 0x107   :  { %v195_v48 = vmul.f32 %v194_v47, %v192_v46 }
 0x109   :  { %v196_v50 = vxor.u32 2147483648, %v195_v48 }
 0x10b   :  { %v197_v8 = vsel %vm114_vm1, %v196_v50, %v195_v48 }
 0x10c   :  { %v200_v54 = vsel %vm113_vm2, %v1655_v10, %v197_v8  ;;  %v22_v10 = vld [vmem:[%s2176_s1 + $0x30] sm:$0xff] }
 0x10d   :  { %1578 = vcosq.f32 %v200_v54  ;;  %1441 = vmatprep.subr.mxu0 %v22_v10 }
 0x10e   :  { %1580 = vsinq.f32 %v200_v54  ;;  %1442 = vmatpush3.msra.mxu0 %v22_v10 }
 0x10f   :  { %1443 = vmatprep.subr.mxu0 %v21_v7 }
 0x110   :  { %1444 = vmatpush3.msra.mxu0 %v21_v7 }
 0x112   :  { %v1575_v59 = vpop.eup %1574 }
 0x113   :  { %v1577_v60 = vpop.eup %1576  ;;  %v316_v0 = vxor.u32 2147483648, %v1575_v59 }
 0x114   :  { %v313_v15 = vxor.u32 2147483648, %v1577_v60 }
 0x115   :  { %v317_v11 = vsel %vm315_vm4, %v316_v0, %v1577_v60 }
 0x116   :  { %v314_v9 = vsel %vm312_vm3, %v1575_v59, %v313_v15 }
 0x117   :  { %v318_v62 = vsel %vm311_vm7, %v314_v9, %v317_v11 }
 0x118   :  { %v319_v17 = vsel %vm308_vm11, nan, %v318_v62 }
 0x11a   :  { %v1579_v3 = vpop.eup %1578 }
 0x11b   :  { %v1581_v51 = vpop.eup %1580  ;;  %v212_v6 = vxor.u32 2147483648, %v1579_v3 }
 0x11c   :  { %v209_v2 = vxor.u32 2147483648, %v1581_v51 }
 0x11d   :  { %v213_v12 = vsel %vm211_vm5, %v212_v6, %v1581_v51 }
 0x11e   :  { %v210_v13 = vsel %vm208_vm6, %v1579_v3, %v209_v2 }
 0x11f   :  { %v214_v14 = vsel %vm207_vm8, %v210_v13, %v213_v12 }
 0x120   :  { %v215_v16 = vsel %vm204_vm10, nan, %v214_v14 }
 0x121   :  { %1434 = vmatprep.mubr.msk.f32.mxu1 %vm324_vm9, %v215_v16 }
 0x122   :  { %1435 = vmatmul.mubr.msk.f32.vlgmr.msra.gmra.mxu1 %vm324_vm9, %v319_v17 }
 0x1e2   :  { %v1436_v26 = vpop.f32.mrf.mxu1 }
 0x1e3   :  { %v1770_v28 = vadd.f32 %v1436_v26, %v323_v24 }
 0x1e4   :  { %v397_v29 = vpop.f32.mrf.mxu1 }
 0x1e5   :  { %v510_v31 = vand.u32 2147483647, %v1770_v28  ;;  %v513_v33 = vand.u32 2139095040, %v1770_v28  ;;  %v1774_v4 = vadd.f32 %v397_v29, %v323_v24  ;;  %vm512_vm11 = vcmp.lt.s32.totalorder %v1770_v28, 0 }
 0x1e7   :  { %v514_v5 = vshrl.u32 %v513_v33, 23  ;;  %v517_v35 = vand.u32 8388607, %v510_v31  ;;  %v409_v37 = vand.u32 2139095040, %v1774_v4  ;;  %v406_v39 = vand.u32 2147483647, %v1774_v4 }
 0x1e9   :  { %v1344_v38 = vadd.s32 4294967169, %v514_v5  ;;  %v410_v25 = vshrl.u32 %v409_v37, 23  ;;  %v518_v41 = vor.u32 8388608, %v517_v35  ;;  %v413_v44 = vand.u32 8388607, %v406_v39 }
 0x1eb   :  { %v520_v40 = vadd.s32 1, %v1344_v38  ;;  %v1340_v42 = vadd.s32 4294967169, %v410_v25  ;;  %v1782_v49 = vshll.u32 %v518_v41, 8  ;;  %v414_v8 = vor.u32 8388608, %v413_v44 }
 0x1ed   :  { %vm521_vm12 = vcmp.gt.s32.totalorder %v520_v40, 0  ;;  %v416_v46 = vadd.s32 1, %v1340_v42  ;;  %v454_v10 = vshll.u32 %v414_v8, 8 }
 0x1ee   :  { %v522_v45 = vsel %vm521_vm12, %v520_v40, 0  ;;  %vm1847_vm12 = vcmp.le.f32.partialorder %v510_v31, 0.7853982 }
 0x1ef   :  { %v523_v47 = vshrl.u32 %v522_v45, 5  ;;  %v524_v48 = vand.u32 31, %v522_v45  ;;  %vm417_vm13 = vcmp.gt.s32.totalorder %v416_v46, 0 }
 0x1f0   :  { %v418_v3 = vsel %vm417_vm13, %v416_v46, 0  ;;  %vm408_vm13 = vcmp.lt.s32.totalorder %v1774_v4, 0 }
 0x1f1   :  { %v525_v50 = vsub.s32 32, %v524_v48  ;;  %v527_v52 = vshll.u32 %v1600_v27, %v524_v48  ;;  %v530_v53 = vshll.u32 %v1601_v30, %v524_v48  ;;  %v533_v54 = vshll.u32 %v1602_v32, %v524_v48 }
 0x1f2   :  { %v536_v55 = vshll.u32 %v1603_v34, %v524_v48  ;;  %v539_v56 = vshll.u32 %v1604_v36, %v524_v48  ;;  %vm542_vm14 = vcmp.lt.s32.totalorder %v523_v47, 1  ;;  %vm544_vm15 = vcmp.lt.s32.totalorder %v523_v47, 3 }
 0x1f3   :  { %v528_v57 = vshrl.u32 %v1601_v30, %v525_v50  ;;  %v531_v58 = vshrl.u32 %v1602_v32, %v525_v50  ;;  %v534_v59 = vshrl.u32 %v1603_v34, %v525_v50  ;;  %v526_v60 = vshrl.u32 %v1600_v27, %v525_v50 }
 0x1f4   :  { %v537_v61 = vshrl.u32 %v1604_v36, %v525_v50  ;;  %v540_v63 = vshrl.u32 %v1605_v43, %v525_v50  ;;  %vm545_vm0 = vcmp.lt.s32.totalorder %v523_v47, 4  ;;  %v420_v9 = vand.u32 31, %v418_v3 }
 0x1f5   :  { %v529_v15 = vor.u32 %v528_v57, %v527_v52  ;;  %v532_v0 = vor.u32 %v531_v58, %v530_v53  ;;  %v535_v1 = vor.u32 %v534_v59, %v533_v54  ;;  %vm543_vm1 = vcmp.lt.s32.totalorder %v523_v47, 2 }
 0x1f6   :  { %v538_v51 = vor.u32 %v537_v61, %v536_v55  ;;  %v541_v6 = vor.u32 %v540_v63, %v539_v56  ;;  %v421_v17 = vsub.s32 32, %v420_v9  ;;  %v419_v24 = vshrl.u32 %v418_v3, 5 }
 0x1f7   :  { %v546_v11 = vsel %vm542_vm14, %v526_v60, %v529_v15  ;;  %v547_v2 = vsel %vm545_vm0, %v535_v1, 2102212464  ;;  %v550_v12 = vsel %vm542_vm14, %v529_v15, %v532_v0  ;;  %v554_v13 = vsel %vm542_vm14, %v532_v0, %v535_v1 }
 0x1f8   :  { %v548_v62 = vsel %vm544_vm15, %v532_v0, %v547_v2  ;;  %v551_v14 = vsel %vm545_vm0, %v538_v51, 920167782  ;;  %v555_v16 = vsel %vm545_vm0, %v541_v6, 1326507024  ;;  %v423_v35 = vshll.u32 %v1600_v27, %v420_v9 }
 0x1f9   :  { %v552_v18 = vsel %vm544_vm15, %v535_v1, %v551_v14  ;;  %v556_v19 = vsel %vm544_vm15, %v538_v51, %v555_v16  ;;  %v549_v7 = vsel %vm543_vm1, %v546_v11, %v548_v62  ;;  %v424_v37 = vshrl.u32 %v1601_v30, %v421_v17 }
 0x1fa   :  { %v553_v20 = vsel %vm543_vm1, %v550_v12, %v552_v18  ;;  %v557_v22 = vsel %vm543_vm1, %v554_v13, %v556_v19  ;;  %v426_v38 = vshll.u32 %v1601_v30, %v420_v9  ;;  %v427_v25 = vshrl.u32 %v1602_v32, %v421_v17 }
 0x1fb   :  { %v1803_v26 = vmul.u32.u64.low %v1782_v49, %v557_v22  ;;  %v1804_v29 = vmul.u32.u64.high %v1782_v49, %v557_v22, %v1803_v26  ;;  %v1807_v33 = vmul.u32.u64.low %v1782_v49, %v553_v20  ;;  %v1808_v5 = vmul.u32.u64.high %v1782_v49, %v553_v20, %v1807_v33 }
 0x1fc   :  { %v429_v40 = vshll.u32 %v1602_v32, %v420_v9  ;;  %v430_v41 = vshrl.u32 %v1603_v34, %v421_v17  ;;  %v432_v42 = vshll.u32 %v1603_v34, %v420_v9  ;;  %v433_v44 = vshrl.u32 %v1604_v36, %v421_v17 }
 0x1fd   :  { %v425_v45 = vor.u32 %v424_v37, %v423_v35  ;;  %v428_v46 = vor.u32 %v427_v25, %v426_v38  ;;  %v435_v47 = vshll.u32 %v1604_v36, %v420_v9  ;;  %v436_v48 = vshrl.u32 %v1605_v43, %v421_v17 }
 0x1fe   :  { %v565_v50 = vmul.u32 %v1782_v49, %v549_v7  ;;  %vm567_vm2 = vc.u32 %v1804_v29, %v1807_v33  ;;  %v568_v52 = vadd.s32 1, %v1808_v5  ;;  %v431_v8 = vor.u32 %v430_v41, %v429_v40 }
 0x1ff   :  { %v422_v53 = vshrl.u32 %v1600_v27, %v421_v17  ;;  %v434_v54 = vor.u32 %v433_v44, %v432_v42  ;;  %v437_v55 = vor.u32 %v436_v48, %v435_v47  ;;  %vm438_vm3 = vcmp.lt.s32.totalorder %v419_v24, 1 }
 0x200   :  { %v569_v56 = vsel %vm567_vm2, %v568_v52, %v1808_v5  ;;  %vm440_vm4 = vcmp.lt.s32.totalorder %v419_v24, 3  ;;  %vm441_vm5 = vcmp.lt.s32.totalorder %v419_v24, 4  ;;  %v446_v57 = vsel %vm438_vm3, %v425_v45, %v428_v46 }
 0x201   :  { %v570_v58 = vadd.s32 %v569_v56, %v565_v50  ;;  %v443_v59 = vsel %vm441_vm5, %v431_v8, 2102212464  ;;  %v447_v60 = vsel %vm441_vm5, %v434_v54, 920167782  ;;  %v450_v49 = vsel %vm438_vm3, %v428_v46, %v431_v8 }
 0x202   :  { %vm439_vm6 = vcmp.lt.s32.totalorder %v419_v24, 2  ;;  %v442_v61 = vsel %vm438_vm3, %v422_v53, %v425_v45  ;;  %v448_v63 = vsel %vm440_vm4, %v431_v8, %v447_v60  ;;  %v451_v15 = vsel %vm441_vm5, %v437_v55, 1326507024 }
 0x203   :  { %v571_v0 = vadd.s32 536870912, %v570_v58  ;;  %v444_v1 = vsel %vm440_vm4, %v428_v46, %v443_v59  ;;  %v449_v3 = vsel %vm439_vm6, %v446_v57, %v448_v63  ;;  %v452_v51 = vsel %vm440_vm4, %v434_v54, %v451_v15 }
 0x204   :  { %v453_v6 = vsel %vm439_vm6, %v450_v49, %v452_v51  ;;  %v1827_v9 = vmul.u32.u64.low %v454_v10, %v449_v3  ;;  %v1828_v11 = vmul.u32.u64.high %v454_v10, %v449_v3, %v1827_v9  ;;  %v445_v62 = vsel %vm439_vm6, %v442_v61, %v444_v1 }
 0x205   :  { %v1830_v2 = vshrl.u32 %v571_v0, 30  ;;  %v1832_v12 = vmul.u32.u64.low %v454_v10, %v453_v6  ;;  %v1833_v13 = vmul.u32.u64.high %v454_v10, %v453_v6, %v1832_v12  ;;  %v461_v18 = vmul.u32 %v454_v10, %v445_v62 }
 0x206   :  { %v464_v16 = vadd.s32 1, %v1828_v11  ;;  %v566_v40 = vadd.s32 %v1807_v33, %v1804_v29  ;;  %vm407_vm14 = vcmp.le.f32.partialorder %v406_v39, 0.7853982  ;;  %vm498_vm5 = vweird.f32 %v1774_v4 }
 0x207   :  { %v573_v14 = vshll.u32 %v1830_v2, 30  ;;  %vm463_vm7 = vc.u32 %v1833_v13, %v1827_v9  ;;  %v596_v12 = vsub.s32 4, %v1830_v2  ;;  %vm602_vm6 = vweird.f32 %v1770_v28 }
 0x208   :  { %v465_v19 = vsel %vm463_vm7, %v464_v16, %v1828_v11 }
 0x209   :  { %v574_v17 = vsub.s32 %v570_v58, %v573_v14  ;;  %v466_v20 = vadd.s32 %v465_v19, %v461_v18  ;;  %v462_v58 = vadd.s32 %v1827_v9, %v1833_v13  ;;  %v597_v16 = vsel %vm512_vm11, %v596_v12, %v1830_v2 }
 0x20a   :  { %v599_v18 = vsel %vm1847_vm12, 0, %v597_v16 }
 0x20b   :  { %v576_v7 = vsub.s32 0, %v574_v17  ;;  %v467_v24 = vadd.s32 536870912, %v466_v20 }
 0x20d   :  { %v1345_v22 = vmin.u32 %v576_v7, %v574_v17  ;;  %v468_v5 = vshrl.u32 %v467_v24, 30  ;;  %v603_v7 = vadd.s32 3, %v599_v18 }
 0x20f   :  { %v578_v26 = vclz %v1345_v22  ;;  %v469_v37 = vshll.u32 %v468_v5, 30  ;;  %v492_v62 = vsub.s32 4, %v468_v5 }
 0x211   :  { %v1346_v35 = vadd.s32 4294967294, %v578_v26  ;;  %v470_v38 = vsub.s32 %v466_v20, %v469_v37  ;;  %v604_v26 = vand.u32 3, %v603_v7 }
 0x213   :  { %vm1347_vm8 = vcmp.lt.s32.totalorder %v1346_v35, 0  ;;  %v472_v42 = vsub.s32 0, %v470_v38  ;;  %vm606_vm15 = vcmp.eq.s32.totalorder %v604_v26, 0  ;;  %vm609_vm0 = vcmp.eq.s32.totalorder %v604_v26, 2 }
 0x214   :  { %v581_v25 = vsel %vm1347_vm8, 0, %v1346_v35  ;;  %vm605_vm3 = vcmp.lt.s32.totalorder %v604_v26, 2 }
 0x215   :  { %v582_v41 = vsub.s32 32, %v581_v25  ;;  %v586_v10 = vsub.s32 4294967266, %v581_v25  ;;  %v583_v44 = vshll.u32 %v574_v17, %v581_v25  ;;  %v1341_v47 = vmin.u32 %v472_v42, %v470_v38 }
 0x216   :  { %v493_v17 = vsel %vm408_vm13, %v492_v62, %v468_v5 }
 0x217   :  { %v584_v45 = vshrl.u32 %v566_v40, %v582_v41  ;;  %v587_v46 = vadd.s32 127, %v586_v10  ;;  %v474_v52 = vclz %v1341_v47  ;;  %v495_v19 = vsel %vm407_vm14, 0, %v493_v17 }
 0x218   :  { %v499_v24 = vadd.s32 3, %v495_v19 }
 0x219   :  { %v585_v48 = vor.u32 %v584_v45, %v583_v44  ;;  %v588_v50 = vshll.u32 %v587_v46, 23  ;;  %v1342_v53 = vadd.s32 4294967294, %v474_v52  ;;  %v616_v52 = vsub.s32 1, %v1761_v21 }
 0x21a   :  { %v500_v37 = vand.u32 3, %v499_v24 }
 0x21b   :  { %v589_v8 = vor.u32 4788187, %v588_v50  ;;  %v592_v55 = vcvt.s32.f32 %v585_v48  ;;  %vm1343_vm10 = vcmp.lt.s32.totalorder %v1342_v53, 0  ;;  %v28_v48 = vld [vmem:[%s2176_s1 + $0x60] sm:$0xff]  ;;  %v27_v50 = vld [vmem:[%s2176_s1 + $0x58] sm:$0xff] }
 0x21c   :  { %v477_v56 = vsel %vm1343_vm10, 0, %v1342_v53  ;;  %vm505_vm1 = vcmp.eq.s32.totalorder %v500_v37, 2  ;;  %vm502_vm2 = vcmp.eq.s32.totalorder %v500_v37, 0  ;;  %vm501_vm4 = vcmp.lt.s32.totalorder %v500_v37, 2  ;;  %1448 = vmatprep.subr.mxu1 %v28_v48 }
 0x21d   :  { %v590_v54 = vand.u32 2147483647, %v589_v8  ;;  %v478_v29 = vsub.s32 32, %v477_v56  ;;  %v482_v33 = vsub.s32 4294967266, %v477_v56  ;;  %v479_v60 = vshll.u32 %v470_v38, %v477_v56  ;;  %1449 = vmatpush3.msra.mxu1 %v28_v48 }
 0x21e   :  { %1450 = vmatprep.subr.mxu1 %v27_v50  ;;  %v617_v8 = vrot.slane %v1767_v23, %v616_v52 }
 0x21f   :  { %v593_v57 = vmul.f32 %v592_v55, %v590_v54  ;;  %v480_v49 = vshrl.u32 %v462_v58, %v478_v29  ;;  %v483_v61 = vadd.s32 127, %v482_v33  ;;  %1451 = vmatpush3.msra.mxu1 %v27_v50 }
 0x221   :  { %v594_v59 = vxor.u32 2147483648, %v593_v57  ;;  %v481_v15 = vor.u32 %v480_v49, %v479_v60  ;;  %v484_v0 = vshll.u32 %v483_v61, 23 }
 0x223   :  { %v595_v63 = vsel %vm512_vm11, %v594_v59, %v593_v57  ;;  %v485_v51 = vor.u32 4788187, %v484_v0  ;;  %v488_v9 = vcvt.s32.f32 %v481_v15 }
 0x224   :  { %v598_v3 = vsel %vm1847_vm12, %v1770_v28, %v595_v63  ;;  %v25_v28 = vld [vmem:[%s2176_s1 + $0x48] sm:$0xff] }
 0x225   :  { %v486_v6 = vand.u32 2147483647, %v485_v51  ;;  %1582 = vcosq.f32 %v598_v3 }
 0x226   :  { %1584 = vsinq.f32 %v598_v3 }
 0x227   :  { %v489_v11 = vmul.f32 %v488_v9, %v486_v6 }
 0x229   :  { %v490_v13 = vxor.u32 2147483648, %v489_v11 }
 0x22b   :  { %v491_v31 = vsel %vm408_vm13, %v490_v13, %v489_v11 }
 0x22c   :  { %v494_v14 = vsel %vm407_vm14, %v1774_v4, %v491_v31  ;;  %v26_v4 = vld [vmem:[%s2176_s1 + $0x50] sm:$0xff] }
 0x22d   :  { %1586 = vcosq.f32 %v494_v14  ;;  %1452 = vmatprep.subr.mxu1 %v26_v4 }
 0x22e   :  { %1588 = vsinq.f32 %v494_v14  ;;  %1453 = vmatpush3.msra.mxu1 %v26_v4 }
 0x22f   :  { %1454 = vmatprep.subr.mxu1 %v25_v28 }
 0x230   :  { %1455 = vmatpush3.msra.mxu1 %v25_v28 }
 0x232   :  { %v1583_v20 = vpop.eup %1582 }
 0x233   :  { %v1585_v22 = vpop.eup %1584  ;;  %v610_v35 = vxor.u32 2147483648, %v1583_v20 }
 0x234   :  { %v607_v39 = vxor.u32 2147483648, %v1585_v22 }
 0x235   :  { %v611_v41 = vsel %vm609_vm0, %v610_v35, %v1585_v22 }
 0x236   :  { %v608_v40 = vsel %vm606_vm15, %v1583_v20, %v607_v39 }
 0x237   :  { %v612_v44 = vsel %vm605_vm3, %v608_v40, %v611_v41 }
 0x238   :  { %v613_v47 = vsel %vm602_vm6, nan, %v612_v44 }
 0x23a   :  { %v1587_v38 = vpop.eup %1586 }
 0x23b   :  { %v1589_v25 = vpop.eup %1588  ;;  %v506_v2 = vxor.u32 2147483648, %v1587_v38 }
 0x23c   :  { %v503_v5 = vxor.u32 2147483648, %v1589_v25 }
 0x23d   :  { %v507_v10 = vsel %vm505_vm1, %v506_v2, %v1589_v25 }
 0x23e   :  { %v504_v42 = vsel %vm502_vm2, %v1587_v38, %v503_v5 }
 0x23f   :  { %v508_v45 = vsel %vm501_vm4, %v504_v42, %v507_v10 }
 0x240   :  { %v509_v46 = vsel %vm498_vm5, nan, %v508_v45 }
 0x241   :  { %1445 = vmatprep.mubr.msk.f32.mxu0 %vm324_vm9, %v509_v46 }
 0x242   :  { %1446 = vmatmul.mubr.msk.f32.vlgmr.msra.gmra.mxu0 %vm324_vm9, %v613_v47 }
 0x302   :  { %v1447_v53 = vpop.f32.mrf.mxu0 }
 0x303   :  { %v1882_v54 = vadd.f32 %v1447_v53, %v617_v8 }
 0x304   :  { %v690_v55 = vpop.f32.mrf.mxu0 }
 0x305   :  { %v803_v56 = vand.u32 2147483647, %v1882_v54  ;;  %v806_v57 = vand.u32 2139095040, %v1882_v54  ;;  %v1886_v58 = vadd.f32 %v690_v55, %v617_v8  ;;  %vm805_vm6 = vcmp.lt.s32.totalorder %v1882_v54, 0 }
 0x307   :  { %v807_v29 = vshrl.u32 %v806_v57, 23  ;;  %v810_v33 = vand.u32 8388607, %v803_v56  ;;  %v702_v59 = vand.u32 2139095040, %v1886_v58  ;;  %v699_v49 = vand.u32 2147483647, %v1886_v58 }
 0x309   :  { %v1354_v60 = vadd.s32 4294967169, %v807_v29  ;;  %v703_v61 = vshrl.u32 %v702_v59, 23  ;;  %v811_v15 = vor.u32 8388608, %v810_v33  ;;  %v706_v1 = vand.u32 8388607, %v699_v49 }
 0x30b   :  { %v813_v63 = vadd.s32 1, %v1354_v60  ;;  %v1350_v0 = vadd.s32 4294967169, %v703_v61  ;;  %v1894_v11 = vshll.u32 %v811_v15, 8  ;;  %v707_v62 = vor.u32 8388608, %v706_v1 }
 0x30d   :  { %vm814_vm7 = vcmp.gt.s32.totalorder %v813_v63, 0  ;;  %v709_v51 = vadd.s32 1, %v1350_v0  ;;  %v747_v50 = vshll.u32 %v707_v62, 8 }
 0x30e   :  { %v815_v3 = vsel %vm814_vm7, %v813_v63, 0  ;;  %vm1959_vm7 = vcmp.le.f32.partialorder %v803_v56, 0.7853982 }
 0x30f   :  { %v816_v6 = vshrl.u32 %v815_v3, 5  ;;  %v817_v9 = vand.u32 31, %v815_v3  ;;  %vm710_vm8 = vcmp.gt.s32.totalorder %v709_v51, 0 }
 0x310   :  { %v711_v37 = vsel %vm710_vm8, %v709_v51, 0  ;;  %vm701_vm8 = vcmp.lt.s32.totalorder %v1886_v58, 0 }
 0x311   :  { %v818_v12 = vsub.s32 32, %v817_v9  ;;  %v820_v13 = vshll.u32 %v1600_v27, %v817_v9  ;;  %v823_v31 = vshll.u32 %v1601_v30, %v817_v9  ;;  %v826_v14 = vshll.u32 %v1602_v32, %v817_v9 }
 0x312   :  { %v829_v16 = vshll.u32 %v1603_v34, %v817_v9  ;;  %v832_v17 = vshll.u32 %v1604_v36, %v817_v9  ;;  %vm835_vm10 = vcmp.lt.s32.totalorder %v816_v6, 1  ;;  %vm837_vm11 = vcmp.lt.s32.totalorder %v816_v6, 3 }
 0x313   :  { %v821_v18 = vshrl.u32 %v1601_v30, %v818_v12  ;;  %v824_v19 = vshrl.u32 %v1602_v32, %v818_v12  ;;  %v827_v7 = vshrl.u32 %v1603_v34, %v818_v12  ;;  %v819_v20 = vshrl.u32 %v1600_v27, %v818_v12 }
 0x314   :  { %v830_v22 = vshrl.u32 %v1604_v36, %v818_v12  ;;  %v833_v24 = vshrl.u32 %v1605_v43, %v818_v12  ;;  %vm838_vm12 = vcmp.lt.s32.totalorder %v816_v6, 4  ;;  %v713_v2 = vand.u32 31, %v711_v37 }
 0x315   :  { %v822_v26 = vor.u32 %v821_v18, %v820_v13  ;;  %v825_v39 = vor.u32 %v824_v19, %v823_v31  ;;  %v828_v35 = vor.u32 %v827_v7, %v826_v14  ;;  %vm836_vm13 = vcmp.lt.s32.totalorder %v816_v6, 2 }
 0x316   :  { %v831_v38 = vor.u32 %v830_v22, %v829_v16  ;;  %v834_v25 = vor.u32 %v833_v24, %v832_v17  ;;  %v714_v46 = vsub.s32 32, %v713_v2  ;;  %v712_v8 = vshrl.u32 %v711_v37, 5 }
 0x317   :  { %v839_v40 = vsel %vm835_vm10, %v819_v20, %v822_v26  ;;  %v840_v41 = vsel %vm838_vm12, %v828_v35, 2102212464  ;;  %v843_v5 = vsel %vm835_vm10, %v822_v26, %v825_v39  ;;  %v847_v10 = vsel %vm835_vm10, %v825_v39, %v828_v35 }
 0x318   :  { %v841_v42 = vsel %vm837_vm11, %v825_v39, %v840_v41  ;;  %v844_v44 = vsel %vm838_vm12, %v831_v38, 920167782  ;;  %v848_v45 = vsel %vm838_vm12, %v834_v25, 1326507024  ;;  %v716_v33 = vshll.u32 %v1600_v27, %v713_v2 }
 0x319   :  { %v845_v47 = vsel %vm837_vm11, %v828_v35, %v844_v44  ;;  %v849_v48 = vsel %vm837_vm11, %v831_v38, %v848_v45  ;;  %v842_v4 = vsel %vm836_vm13, %v839_v40, %v841_v42  ;;  %v717_v59 = vshrl.u32 %v1601_v30, %v714_v46 }
 0x31a   :  { %v846_v28 = vsel %vm836_vm13, %v843_v5, %v845_v47  ;;  %v850_v52 = vsel %vm836_vm13, %v847_v10, %v849_v48  ;;  %v719_v60 = vshll.u32 %v1601_v30, %v713_v2  ;;  %v720_v61 = vshrl.u32 %v1602_v32, %v714_v46 }
 0x31b   :  { %v1915_v53 = vmul.u32.u64.low %v1894_v11, %v850_v52  ;;  %v1916_v55 = vmul.u32.u64.high %v1894_v11, %v850_v52, %v1915_v53  ;;  %v1919_v57 = vmul.u32.u64.low %v1894_v11, %v846_v28  ;;  %v1920_v29 = vmul.u32.u64.high %v1894_v11, %v846_v28, %v1919_v57 }
 0x31c   :  { %v722_v63 = vshll.u32 %v1602_v32, %v713_v2  ;;  %v723_v15 = vshrl.u32 %v1603_v34, %v714_v46  ;;  %v725_v0 = vshll.u32 %v1603_v34, %v713_v2  ;;  %v726_v1 = vshrl.u32 %v1604_v36, %v714_v46 }
 0x31d   :  { %v718_v3 = vor.u32 %v717_v59, %v716_v33  ;;  %v721_v51 = vor.u32 %v720_v61, %v719_v60  ;;  %v728_v6 = vshll.u32 %v1604_v36, %v713_v2  ;;  %v729_v9 = vshrl.u32 %v1605_v43, %v714_v46 }
 0x31e   :  { %v858_v12 = vmul.u32 %v1894_v11, %v842_v4  ;;  %vm860_vm14 = vc.u32 %v1916_v55, %v1919_v57  ;;  %v861_v30 = vadd.s32 1, %v1920_v29  ;;  %v724_v32 = vor.u32 %v723_v15, %v722_v63 }
 0x31f   :  { %v715_v13 = vshrl.u32 %v1600_v27, %v714_v46  ;;  %v727_v62 = vor.u32 %v726_v1, %v725_v0  ;;  %v730_v34 = vor.u32 %v729_v9, %v728_v6  ;;  %vm731_vm15 = vcmp.lt.s32.totalorder %v712_v8, 1 }
 0x320   :  { %v862_v31 = vsel %vm860_vm14, %v861_v30, %v1920_v29  ;;  %vm733_vm0 = vcmp.lt.s32.totalorder %v712_v8, 3  ;;  %vm734_vm1 = vcmp.lt.s32.totalorder %v712_v8, 4  ;;  %v739_v36 = vsel %vm731_vm15, %v718_v3, %v721_v51 }
 0x321   :  { %v863_v14 = vadd.s32 %v862_v31, %v858_v12  ;;  %v736_v43 = vsel %vm734_vm1, %v724_v32, 2102212464  ;;  %v740_v16 = vsel %vm734_vm1, %v727_v62, 920167782  ;;  %v743_v11 = vsel %vm731_vm15, %v721_v51, %v724_v32 }
 0x322   :  { %vm732_vm2 = vcmp.lt.s32.totalorder %v712_v8, 2  ;;  %v735_v17 = vsel %vm731_vm15, %v715_v13, %v718_v3  ;;  %v741_v18 = vsel %vm733_vm0, %v724_v32, %v740_v16  ;;  %v744_v19 = vsel %vm734_vm1, %v730_v34, 1326507024 }
 0x323   :  { %v864_v7 = vadd.s32 536870912, %v863_v14  ;;  %v737_v20 = vsel %vm733_vm0, %v721_v51, %v736_v43  ;;  %v742_v22 = vsel %vm732_vm2, %v739_v36, %v741_v18  ;;  %v745_v27 = vsel %vm733_vm0, %v727_v62, %v744_v19 }
 0x324   :  { %v746_v24 = vsel %vm732_vm2, %v743_v11, %v745_v27  ;;  %v1939_v26 = vmul.u32.u64.low %v747_v50, %v742_v22  ;;  %v1940_v39 = vmul.u32.u64.high %v747_v50, %v742_v22, %v1939_v26  ;;  %v738_v25 = vsel %vm732_vm2, %v735_v17, %v737_v20 }
 0x325   :  { %v1942_v35 = vshrl.u32 %v864_v7, 30  ;;  %v1944_v37 = vmul.u32.u64.low %v747_v50, %v746_v24  ;;  %v1945_v38 = vmul.u32.u64.high %v747_v50, %v746_v24, %v1944_v37  ;;  %v754_v5 = vmul.u32 %v747_v50, %v738_v25 }
 0x326   :  { %v757_v40 = vadd.s32 1, %v1940_v39  ;;  %v859_v53 = vadd.s32 %v1919_v57, %v1916_v55  ;;  %vm700_vm10 = vcmp.le.f32.partialorder %v699_v49, 0.7853982  ;;  %vm791_vm1 = vweird.f32 %v1886_v58 }
 0x327   :  { %v866_v2 = vshll.u32 %v1942_v35, 30  ;;  %vm756_vm3 = vc.u32 %v1945_v38, %v1939_v26  ;;  %v755_v32 = vadd.s32 %v1939_v26, %v1945_v38  ;;  %v889_v20 = vsub.s32 4, %v1942_v35 }
 0x328   :  { %v758_v10 = vsel %vm756_vm3, %v757_v40, %v1940_v39  ;;  %vm895_vm2 = vweird.f32 %v1882_v54  ;;  %vm1609_vm3 = vmmov 0  }
 0x329   :  { %v867_v41 = vsub.s32 %v863_v14, %v866_v2  ;;  %v759_v44 = vadd.s32 %v758_v10, %v754_v5  ;;  %v890_v26 = vsel %vm805_vm6, %v889_v20, %v1942_v35 }
 0x32a   :  { %v892_v37 = vsel %vm1959_vm7, 0, %v890_v26 }
 0x32b   :  { %v869_v42 = vsub.s32 0, %v867_v41  ;;  %v760_v46 = vadd.s32 536870912, %v759_v44  ;;  %v896_v25 = vadd.s32 3, %v892_v37 }
 0x32d   :  { %v1355_v45 = vmin.u32 %v869_v42, %v867_v41  ;;  %v761_v48 = vshrl.u32 %v760_v46, 30  ;;  %v897_v5 = vand.u32 3, %v896_v25 }
 0x32f   :  { %v871_v47 = vclz %v1355_v45  ;;  %v762_v28 = vshll.u32 %v761_v48, 30  ;;  %v785_v27 = vsub.s32 4, %v761_v48  ;;  %vm899_vm11 = vcmp.eq.s32.totalorder %v897_v5, 0 }
 0x330   :  { %vm902_vm12 = vcmp.eq.s32.totalorder %v897_v5, 2  ;;  %vm898_vm15 = vcmp.lt.s32.totalorder %v897_v5, 2 }
 0x331   :  { %v1356_v4 = vadd.s32 4294967294, %v871_v47  ;;  %v763_v52 = vsub.s32 %v759_v44, %v762_v28  ;;  %v786_v39 = vsel %vm701_vm8, %v785_v27, %v761_v48 }
 0x332   :  { %v788_v38 = vsel %vm700_vm10, 0, %v786_v39  ;;  %v1051_v39 = vld [vmem:[%s2178_s2 + $0x130] sm:$0xff] }
 0x333   :  { %vm1357_vm4 = vcmp.lt.s32.totalorder %v1356_v4, 0  ;;  %v765_v33 = vsub.s32 0, %v763_v52 }
 0x334   :  { %v874_v8 = vsel %vm1357_vm4, 0, %v1356_v4  ;;  %vm1041_vm4 = vcmask 523264  }
 0x335   :  { %v875_v29 = vsub.s32 32, %v874_v8  ;;  %v879_v50 = vsub.s32 4294967266, %v874_v8  ;;  %v876_v59 = vshll.u32 %v867_v41, %v874_v8  ;;  %v1351_v63 = vmin.u32 %v765_v33, %v763_v52 }
 0x336   :  { %v792_v41 = vadd.s32 3, %v788_v38  ;;  %v1047_v38 = vld [vmem:[%s2177_s0 + $0x18] sm:$0xff] }
 0x337   :  { %v877_v60 = vshrl.u32 %v859_v53, %v875_v29  ;;  %v880_v61 = vadd.s32 127, %v879_v50  ;;  %v767_v1 = vclz %v1351_v63  ;;  %v909_v50 = vsub.s32 2, %v1761_v21 }
 0x338   :  { %v793_v42 = vand.u32 3, %v792_v41  ;;  %v1050_v41 = vld [vmem:[%s2178_s2 + $0x128] sm:$0xff] }
 0x339   :  { %v878_v15 = vor.u32 %v877_v60, %v876_v59  ;;  %v881_v0 = vshll.u32 %v880_v61, 23  ;;  %v1352_v51 = vadd.s32 4294967294, %v767_v1  ;;  %v910_v33 = vrot.slane %v1767_v23, %v909_v50  ;;  %v1156_v50 = vld [vmem:[%s2178_s2 + $0x68] sm:$0xff] }
 0x33a   :  { %vm798_vm13 = vcmp.eq.s32.totalorder %v793_v42, 2  ;;  %vm795_vm14 = vcmp.eq.s32.totalorder %v793_v42, 0  ;;  %vm794_vm0 = vcmp.lt.s32.totalorder %v793_v42, 2  ;;  %v1048_v42 = vld [vmem:[%s2178_s2 + $0x118] sm:$0xff] }
 0x33b   :  { %v882_v3 = vor.u32 4788187, %v881_v0  ;;  %v885_v9 = vcvt.s32.f32 %v878_v15  ;;  %vm1353_vm5 = vcmp.lt.s32.totalorder %v1352_v51, 0 }
 0x33c   :  { %v770_v12 = vsel %vm1353_vm5, 0, %v1352_v51 }
 0x33d   :  { %v883_v6 = vand.u32 2147483647, %v882_v3  ;;  %v771_v55 = vsub.s32 32, %v770_v12  ;;  %v775_v57 = vsub.s32 4294967266, %v770_v12  ;;  %v772_v62 = vshll.u32 %v763_v52, %v770_v12 }
 0x33f   :  { %v886_v30 = vmul.f32 %v885_v9, %v883_v6  ;;  %v773_v34 = vshrl.u32 %v755_v32, %v771_v55  ;;  %v776_v31 = vadd.s32 127, %v775_v57 }
 0x341   :  { %v887_v13 = vxor.u32 2147483648, %v886_v30  ;;  %v774_v14 = vor.u32 %v773_v34, %v772_v62  ;;  %v777_v43 = vshll.u32 %v776_v31, 23 }
 0x343   :  { %v888_v36 = vsel %vm805_vm6, %v887_v13, %v886_v30  ;;  %v778_v17 = vor.u32 4788187, %v777_v43  ;;  %v781_v19 = vcvt.s32.f32 %v774_v14 }
 0x344   :  { %v891_v11 = vsel %vm1959_vm7, %v1882_v54, %v888_v36 }
 0x345   :  { %v779_v18 = vand.u32 2147483647, %v778_v17  ;;  %1590 = vcosq.f32 %v891_v11 }
 0x346   :  { %1592 = vsinq.f32 %v891_v11 }
 0x347   :  { %v782_v7 = vmul.f32 %v781_v19, %v779_v18 }
 0x349   :  { %v783_v22 = vxor.u32 2147483648, %v782_v7 }
 0x34b   :  { %v784_v56 = vsel %vm701_vm8, %v783_v22, %v782_v7  ;;  %v1607_v22 = vmov 0.0  }
 0x34c   :  { %v787_v24 = vsel %vm700_vm10, %v1886_v58, %v784_v56  ;;  %1459 = vmatprep.subr.mxu0 %v1607_v22  ;;  %1470 = vmatprep.subr.mxu1 %v1607_v22 }
 0x34d   :  { %1594 = vcosq.f32 %v787_v24  ;;  %1467 = vmatprep.mubr.msk.f32.mxu0 %vm1609_vm3, %v1607_v22 }
 0x34e   :  { %1596 = vsinq.f32 %v787_v24 }
 0x352   :  { %v1591_v2 = vpop.eup %1590 }
 0x353   :  { %v1593_v40 = vpop.eup %1592  ;;  %v903_v10 = vxor.u32 2147483648, %v1591_v2 }
 0x354   :  { %v900_v49 = vxor.u32 2147483648, %v1593_v40 }
 0x355   :  { %v904_v47 = vsel %vm902_vm12, %v903_v10, %v1593_v40  ;;  %v1049_v40 = vld [vmem:[%s2178_s2 + $0x120] sm:$0xff]  ;;  %v1046_v10 = vld [vmem:[%s2177_s0 + $0x10] sm:$0xff] }
 0x356   :  { %v901_v46 = vsel %vm899_vm11, %v1591_v2, %v900_v49 }
 0x357   :  { %v905_v52 = vsel %vm898_vm15, %v901_v46, %v904_v47  ;;  %v1045_v46 = vld [vmem:[%s2177_s0 + $0x8] sm:$0xff] }
 0x358   :  { %v906_v29 = vsel %vm895_vm2, nan, %v905_v52 }
 0x35a   :  { %v1595_v44 = vpop.eup %1594 }
 0x35b   :  { %v1597_v45 = vpop.eup %1596  ;;  %v799_v35 = vxor.u32 2147483648, %v1595_v44 }
 0x35c   :  { %v796_v48 = vxor.u32 2147483648, %v1597_v45 }
 0x35d   :  { %v800_v4 = vsel %vm798_vm13, %v799_v35, %v1597_v45 }
 0x35e   :  { %v797_v28 = vsel %vm795_vm14, %v1595_v44, %v796_v48 }
 0x35f   :  { %v801_v8 = vsel %vm794_vm0, %v797_v28, %v800_v4  ;;  %v1044_v4 = vld [vmem:[%s2177_s0] sm:$0xff] }
 0x360   :  { %v802_v53 = vsel %vm791_vm1, nan, %v801_v8  ;;  %v1060_v8 = vld [vmem:[%s2176_s1 + $0x70] sm:$0xff] }
 0x361   :  { %1456 = vmatprep.mubr.msk.f32.mxu1 %vm324_vm9, %v802_v53  ;;  %v1158_v53 = vld [vmem:[%s2178_s2 + $0x78] sm:$0xff] }
 0x362   :  { %1457 = vmatmul.mubr.msk.f32.vlgmr.msra.gmra.mxu1 %vm324_vm9, %v906_v29  ;;  %v1157_v29 = vld [vmem:[%s2178_s2 + $0x70] sm:$0xff] }
 0x363   :  { %1502 = vmatprep.mubr.msk.f32.mxu1 %vm1609_vm3, %v1607_v22  ;;  %1471 = vmatpush3.msra.mxu1 %v1158_v53 }
 0x364   :  { %1472 = vmatprep.subr.mxu1 %v1607_v22 }
 0x365   :  { %1473 = vmatpush3.msra.mxu1 %v1157_v29 }
 0x366   :  { %1474 = vmatprep.subr.mxu1 %v1607_v22 }
 0x367   :  { %1475 = vmatpush3.msra.mxu1 %v1156_v50 }
 0x368   :  { %1476 = vmatprep.subr.mxu1 %v1607_v22 }
 0x422   :  { %v1458_v59 = vpop.f32.mrf.mxu1 }
 0x423   :  { %v989_v60 = vadd.f32 %v1458_v59, %v910_v33  ;;  %v1154_v59 = vld [vmem:[%s2178_s2 + $0x58] sm:$0xff] }
 0x424   :  { %v983_v61 = vpop.f32.mrf.mxu1 }
 0x425   :  { %v1004_v63 = vmul.f32 %v989_v60, %v989_v60  ;;  %v984_v15 = vadd.f32 %v983_v61, %v910_v33  ;;  %v993_v58 = vsel %vm324_vm9, %v989_v60, 0.0  ;;  %v1155_v33 = vld [vmem:[%s2178_s2 + $0x60] sm:$0xff]  ;;  %v1152_v61 = vld [vmem:[%s2178_s2 + $0x48] sm:$0xff] }
 0x426   :  { %1477 = vmatpush3.msra.mxu1 %v1155_v33 }
 0x427   :  { %v992_v0 = vsel %vm324_vm9, %v984_v15, 0.0  ;;  %v1003_v1 = vmul.f32 %v984_v15, %v984_v15  ;;  %v1006_v3 = vsel %vm324_vm9, %v1004_v63, 0.0  ;;  %1478 = vmatprep.subr.mxu1 %v1607_v22  ;;  %v1151_v63 = vld [vmem:[%s2178_s2 + $0x40] sm:$0xff] }
 0x428   :  { %v994_v54 = vadd.f32 %v993_v58, %v992_v0  ;;  %1479 = vmatpush3.msra.mxu1 %v1154_v59  ;;  %v1149_v58 = vld [vmem:[%s2178_s2 + $0x30] sm:$0xff]  ;;  %v1148_v0 = vld [vmem:[%s2178_s2 + $0x28] sm:$0xff] }
 0x429   :  { %v1005_v51 = vsel %vm324_vm9, %v1003_v1, 0.0  ;;  %1480 = vmatprep.subr.mxu1 %v1607_v22  ;;  %v1147_v1 = vld [vmem:[%s2178_s2 + $0x20] sm:$0xff] }
 0x42a   :  { %v995_v6 = vrot.slane %v994_v54, 4  ;;  %v1007_v9 = vadd.f32 %v1006_v3, %v1005_v51  ;;  %v1145_v3 = vld [vmem:[%s2178_s2 + $0x10] sm:$0xff]  ;;  %v1144_v51 = vld [vmem:[%s2178_s2 + $0x8] sm:$0xff] }
 0x42c   :  { %v996_v21 = vadd.f32 %v995_v6, %v994_v54  ;;  %v1008_v12 = vrot.slane %v1007_v9, 4  ;;  %v1146_v54 = vld [vmem:[%s2178_s2 + $0x18] sm:$0xff]  ;;  %v1143_v6 = vld [vmem:[%s2178_s2] sm:$0xff] }
 0x42e   :  { %v997_v23 = vrot.slane %v996_v21, 2  ;;  %v1009_v30 = vadd.f32 %v1008_v12, %v1007_v9  ;;  %v1245_v9 = vld [vmem:[%s2178_s2 + $0xf8] sm:$0xff]  ;;  %v1243_v12 = vld [vmem:[%s2178_s2 + $0xe8] sm:$0xff] }
 0x430   :  { %v998_v32 = vadd.f32 %v997_v23, %v996_v21  ;;  %v1010_v55 = vrot.slane %v1009_v30, 2  ;;  %v1244_v21 = vld [vmem:[%s2178_s2 + $0xf0] sm:$0xff]  ;;  %v1242_v23 = vld [vmem:[%s2178_s2 + $0xe0] sm:$0xff] }
 0x432   :  { %v999_v57 = vrot.slane %v998_v32, 1  ;;  %v1011_v13 = vadd.f32 %v1010_v55, %v1009_v30 }
 0x434   :  { %v1000_v62 = vadd.f32 %v999_v57, %v998_v32  ;;  %v1012_v34 = vrot.slane %v1011_v13, 1  ;;  %v1241_v32 = vld [vmem:[%s2178_s2 + $0xd8] sm:$0xff]  ;;  %v1240_v57 = vld [vmem:[%s2178_s2 + $0xd0] sm:$0xff] }
 0x436   :  { %v1002_v31 = vmul.f32 0.0625, %v1000_v62  ;;  %v1013_v36 = vadd.f32 %v1012_v34, %v1011_v13  ;;  %v1239_v13 = vld [vmem:[%s2178_s2 + $0xc8] sm:$0xff]  ;;  %v1238_v62 = vld [vmem:[%s2178_s2 + $0xc0] sm:$0xff]  ;;  %v1237_v34 = vld [vmem:[%s2178_s2 + $0xb8] sm:$0xff] }
 0x438   :  { %v1014_v14 = vmul.f32 0.0625, %v1013_v36  ;;  %v1017_v43 = vmul.f32 %v1002_v31, %v1002_v31  ;;  %v1016_v17 = vsub.f32 %v989_v60, %v1002_v31  ;;  %v1015_v7 = vsub.f32 %v984_v15, %v1002_v31  ;;  %v1153_v60 = vld [vmem:[%s2178_s2 + $0x50] sm:$0xff]  ;;  %v1150_v15 = vld [vmem:[%s2178_s2 + $0x38] sm:$0xff]  ;;  %v1235_v36 = vld [vmem:[%s2178_s2 + $0xa8] sm:$0xff] }
 0x439   :  { %1481 = vmatpush3.msra.mxu1 %v1153_v60  ;;  %v1236_v31 = vld [vmem:[%s2178_s2 + $0xb0] sm:$0xff] }
 0x43a   :  { %v1018_v16 = vsub.f32 %v1014_v14, %v1017_v43  ;;  %1482 = vmatprep.subr.mxu1 %v1607_v22  ;;  %v1234_v14 = vld [vmem:[%s2178_s2 + $0xa0] sm:$0xff]  ;;  %v1233_v43 = vld [vmem:[%s2178_s2 + $0x98] sm:$0xff] }
 0x43b   :  { %1483 = vmatpush3.msra.mxu1 %v1152_v61 }
 0x43c   :  { %v1019_v11 = vadd.f32 1e-05, %v1018_v16  ;;  %1484 = vmatprep.subr.mxu1 %v1607_v22  ;;  %v1232_v16 = vld [vmem:[%s2178_s2 + $0x90] sm:$0xff] }
 0x43d   :  { %1485 = vmatpush3.msra.mxu1 %v1151_v63 }
 0x43e   :  { %1598 = vrsqrt.f32 %v1019_v11  ;;  %1486 = vmatprep.subr.mxu1 %v1607_v22  ;;  %v1134_v11 = vld [vmem:[%s2178_s2 + $0x100] sm:$0xff] }
 0x43f   :  { %1487 = vmatpush3.msra.mxu1 %v1150_v15 }
 0x440   :  { %1488 = vmatprep.subr.mxu1 %v1607_v22 }
 0x441   :  { %1489 = vmatpush3.msra.mxu1 %v1149_v58 }
 0x442   :  { %1490 = vmatprep.subr.mxu1 %v1607_v22 }
 0x443   :  { %1491 = vmatpush3.msra.mxu1 %v1148_v0 }
 0x444   :  { %1492 = vmatprep.subr.mxu1 %v1607_v22 }
 0x445   :  { %1493 = vmatpush3.msra.mxu1 %v1147_v1 }
 0x446   :  { %1494 = vmatprep.subr.mxu1 %v1607_v22 }
 0x447   :  { %1495 = vmatpush3.msra.mxu1 %v1146_v54 }
 0x448   :  { %1496 = vmatprep.subr.mxu1 %v1607_v22 }
 0x449   :  { %1497 = vmatpush3.msra.mxu1 %v1145_v3 }
 0x44a   :  { %1498 = vmatprep.subr.mxu1 %v1607_v22 }
 0x44b   :  { %v1599_v18 = vpop.eup %1598  ;;  %1499 = vmatpush3.msra.mxu1 %v1144_v51 }
 0x44c   :  { %v1022_v19 = vmul.f32 %v1599_v18, %v1016_v17  ;;  %v1021_v20 = vmul.f32 %v1599_v18, %v1015_v7  ;;  %1500 = vmatprep.subr.mxu1 %v1607_v22  ;;  %v1138_v17 = vld [vmem:[%s2178_s2 + $0x108] sm:$0xff] }
 0x44d   :  { %1501 = vmatpush3.msra.mxu1 %v1143_v6 }
 0x44e   :  { %1027 = vrot.lane.b32.xlu0 %v1022_v19, %s1606_s17 }
 0x452   :  { %1025 = vrot.lane.b32.xlu0 %v1021_v20, %s1606_s17 }
 0x4c0   :  { %v1028_v27 = vpop.permute.xlu0 %1027 }
 0x4c1   :  { %v1032_v56 = vsel %vm324_vm9, %v1022_v19, %v1028_v27 }
 0x4c2   :  { %1037 = vrot.lane.b32.xlu1 %v1032_v56, %s1608_s18 }
 0x4c4   :  { %v1026_v24 = vpop.permute.xlu0 %1025 }
 0x4c5   :  { %v1031_v26 = vsel %vm324_vm9, %v1021_v20, %v1026_v24  ;;  %v1141_v20 = vld [vmem:[%s2178_s2 + $0x110] sm:$0xff]  ;;  %v1231_v24 = vld [vmem:[%s2178_s2 + $0x88] sm:$0xff] }
 0x4c6   :  { %1035 = vrot.lane.b32.xlu1 %v1031_v26, %s1608_s18 }
 0x534   :  { %v1038_v37 = vpop.permute.xlu1 %1037 }
 0x535   :  { %v1043_v25 = vsel %vm1041_vm4, %v1032_v56, %v1038_v37 }
 0x536   :  { %v1055_v2 = vmul.f32 %v1051_v39, %v1043_v25  ;;  %v1053_v45 = vmul.f32 %v1049_v40, %v1043_v25  ;;  %v1316_v40 = vld [vmem:[%s2177_s0 + $0x20] sm:$0xff] }
 0x538   :  { %v1059_v5 = vadd.f32 %v1055_v2, %v1047_v38  ;;  %v1036_v49 = vpop.permute.xlu1 %1035  ;;  %v1057_v28 = vadd.f32 %v1053_v45, %v1045_v46 }
 0x539   :  { %v1042_v44 = vsel %vm1041_vm4, %v1031_v26, %v1036_v49  ;;  %v1230_v26 = vld [vmem:[%s2178_s2 + $0x80] sm:$0xff] }
 0x53a   :  { %v1054_v35 = vmul.f32 %v1050_v41, %v1042_v44  ;;  %1460 = vmatpush3.msra.mxu0 %v1059_v5  ;;  %v1052_v47 = vmul.f32 %v1048_v42, %v1042_v44  ;;  %v1318_v41 = vld [vmem:[%s2177_s0 + $0x28] sm:$0xff] }
 0x53b   :  { %1461 = vmatprep.subr.mxu0 %v1607_v22 }
 0x53c   :  { %v1058_v48 = vadd.f32 %v1054_v35, %v1046_v10  ;;  %v1056_v52 = vadd.f32 %v1052_v47, %v1044_v4 }
 0x53e   :  { %1462 = vmatpush3.msra.mxu0 %v1058_v48 }
 0x53f   :  { %1463 = vmatprep.subr.mxu0 %v1607_v22 }
 0x540   :  { %1464 = vmatpush3.msra.mxu0 %v1057_v28 }
 0x541   :  { %1465 = vmatprep.subr.mxu0 %v1607_v22 }
 0x542   :  { %1466 = vmatpush3.msra.mxu0 %v1056_v52 }
 0x543   :  { %1468 = vmatmul.mubr.msk.f32.vlgmr.msra.gmra.mxu0 %vm324_vm9, %v1060_v8  ;;  %1505 = vmatprep.subr.mxu0 %v1607_v22 }
 0x544   :  { %1537 = vmatprep.mubr.msk.f32.mxu0 %vm1609_vm3, %v1607_v22  ;;  %1506 = vmatpush3.msra.mxu0 %v1245_v9 }
 0x545   :  { %1507 = vmatprep.subr.mxu0 %v1607_v22 }
 0x546   :  { %1508 = vmatpush3.msra.mxu0 %v1244_v21 }
 0x547   :  { %1509 = vmatprep.subr.mxu0 %v1607_v22 }
 0x548   :  { %1510 = vmatpush3.msra.mxu0 %v1243_v12 }
 0x549   :  { %1511 = vmatprep.subr.mxu0 %v1607_v22 }
 0x54a   :  { %1512 = vmatpush3.msra.mxu0 %v1242_v23 }
 0x54b   :  { %1513 = vmatprep.subr.mxu0 %v1607_v22 }
 0x54c   :  { %1514 = vmatpush3.msra.mxu0 %v1241_v32 }
 0x54d   :  { %1515 = vmatprep.subr.mxu0 %v1607_v22 }
 0x54e   :  { %1516 = vmatpush3.msra.mxu0 %v1240_v57 }
 0x54f   :  { %1517 = vmatprep.subr.mxu0 %v1607_v22 }
 0x550   :  { %1518 = vmatpush3.msra.mxu0 %v1239_v13 }
 0x551   :  { %1519 = vmatprep.subr.mxu0 %v1607_v22 }
 0x552   :  { %1520 = vmatpush3.msra.mxu0 %v1238_v62 }
 0x553   :  { %1521 = vmatprep.subr.mxu0 %v1607_v22 }
 0x554   :  { %1522 = vmatpush3.msra.mxu0 %v1237_v34 }
 0x555   :  { %1523 = vmatprep.subr.mxu0 %v1607_v22 }
 0x556   :  { %1524 = vmatpush3.msra.mxu0 %v1236_v31 }
 0x557   :  { %1525 = vmatprep.subr.mxu0 %v1607_v22 }
 0x558   :  { %1526 = vmatpush3.msra.mxu0 %v1235_v36 }
 0x559   :  { %1527 = vmatprep.subr.mxu0 %v1607_v22 }
 0x55a   :  { %1528 = vmatpush3.msra.mxu0 %v1234_v14 }
 0x55b   :  { %1529 = vmatprep.subr.mxu0 %v1607_v22 }
 0x55c   :  { %1530 = vmatpush3.msra.mxu0 %v1233_v43 }
 0x55d   :  { %1531 = vmatprep.subr.mxu0 %v1607_v22 }
 0x55e   :  { %1532 = vmatpush3.msra.mxu0 %v1232_v16 }
 0x55f   :  { %1533 = vmatprep.subr.mxu0 %v1607_v22 }
 0x560   :  { %1534 = vmatpush3.msra.mxu0 %v1231_v24 }
 0x561   :  { %1535 = vmatprep.subr.mxu0 %v1607_v22 }
 0x562   :  { %1536 = vmatpush3.msra.mxu0 %v1230_v26 }
 0x603   :  { %v1130_v30 = vpop.f32.mrf.mxu0 }
 0x604   :  { %1136 = vrot.lane.b32.xlu0 %v1130_v30, %s1608_s18  ;;  %v1135_v19 = vmul.f32 %v1134_v11, %v1130_v30 }
 0x605   :  { %v1469_v55 = vpop.f32.mrf.mxu0 }
 0x676   :  { %v1137_v18 = vpop.permute.xlu0 %1136 }
 0x677   :  { %v1139_v7 = vmul.f32 %v1138_v17, %v1137_v18 }
 0x679   :  { %v1140_v27 = vadd.f32 %v1139_v7, %v1135_v19 }
 0x67b   :  { %v1142_v56 = vadd.f32 %v1141_v20, %v1140_v27 }
 0x67d   :  { %1503 = vmatmul.mubr.f32.vlgmr.msra.gmra.mxu1 %v1142_v56 }
 0x73d   :  { %v1225_v39 = vpop.f32.mrf.mxu1 }
 0x73e   :  { %v1229_v37 = vmax.f32 %v1225_v39, 0.0 }
 0x73f   :  { %v1504_v38 = vpop.f32.mrf.mxu1 }
 0x740   :  { %1538 = vmatmul.mubr.f32.vlgmr.msra.gmra.mxu0 %v1229_v37 }
 0x800   :  { %v1312_v25 = vpop.f32.mrf.mxu0 }
 0x801   :  { %1319 = vrot.lane.b32.xlu1 %v1312_v25, %s1608_s18  ;;  %v1317_v49 = vmul.f32 %v1316_v40, %v1312_v25 }
 0x802   :  { %v1539_v2 = vpop.f32.mrf.mxu0 }
 0x873   :  { %v1320_v5 = vpop.permute.xlu1 %1319 }
 0x874   :  { %v1321_v22 = vmul.f32 %v1320_v5, %v1318_v41 }
 0x876   :  { %v1322_v10 = vadd.f32 %v1321_v22, %v1317_v49 }
 0x878   :  { %1323 = vst [vmem:[%s2179_s3] sm:$0xff] %v1322_v10 }

</bundles_post_ra>
